<compile_context>
chip_gen: v6e
topology: v6e:2x2x1
jax: 0.10.0
libtpu: 0.0.40
codegen_flags: <defaults>
</compile_context>

<pallas_src>
import jax
import jax.numpy as jnp
from jax.experimental import pallas as pl
from jax.experimental.pallas import tpu as pltpu

IN_FEATURES = 3072
HIDDEN = 128
OUT_FEATURES = 10
OUT_PAD = 128          # lane-dense output width (real 10 logits live in [:, :10])
ROW_ALIGN = 16         # bf16 sublane packing: keep batch tiles a multiple of 16
MAX_TILE_B = 2048      # 12 MiB bf16 x tile; 24 MiB double-buffered -> fits v7x's 64 MiB VMEM


def mlp_kernel(x_ref, w1_ref, b1_ref, w2_ref, b2_ref, o_ref):
    # x_ref:  (TILE_B, 3072) bf16   w1_ref: (3072, 128) bf16
    # b1_ref: (1, 128) f32          w2_ref: (128, 128) f32   b2_ref: (1, 128) f32
    # o_ref:  (TILE_B, 128) f32
    h = jnp.dot(x_ref[...], w1_ref[...], preferred_element_type=jnp.float32)
    h = jnp.maximum(h + b1_ref[...], 0.0)                       # ReLU
    o_ref[...] = jnp.dot(h, w2_ref[...], preferred_element_type=jnp.float32) + b2_ref[...]


def prepare_params(w1, b1, w2, b2):
    """One-time layout/precision prep of PyTorch-convention Linear params.

    w1: (128, 3072)  b1: (128,)   w2: (10, 128)  b2: (10,)
    """
    w1t = jnp.asarray(w1, jnp.float32).T.astype(jnp.bfloat16)           # (3072, 128) bf16
    b1r = jnp.asarray(b1, jnp.float32).reshape(1, HIDDEN)               # (1, 128) f32
    w2t_pad = jnp.zeros((HIDDEN, OUT_PAD), jnp.float32).at[:, :OUT_FEATURES].set(
        jnp.asarray(w2, jnp.float32).T)                                  # (128, 128) f32
    b2_pad = jnp.zeros((1, OUT_PAD), jnp.float32).at[:, :OUT_FEATURES].set(
        jnp.asarray(b2, jnp.float32).reshape(1, OUT_FEATURES))           # (1, 128) f32
    return w1t, b1r, w2t_pad, b2_pad


def _run_pallas(x2d_bf16, params, tile_b, single_buffer_weights):
    n = x2d_bf16.shape[0]
    resident_kwargs = {"pipeline_mode": pl.Buffered(1)} if single_buffer_weights else {}
    return pl.pallas_call(
        mlp_kernel,
        out_shape=jax.ShapeDtypeStruct((n, OUT_PAD), jnp.float32),
        grid_spec=pltpu.PrefetchScalarGridSpec(
            num_scalar_prefetch=0,
            grid=(pl.cdiv(n, tile_b),),
            in_specs=[
                # x: streamed per batch tile (auto double-buffered; ragged last block masked).
                pl.BlockSpec((tile_b, IN_FEATURES), lambda i: (i, 0)),
                # weights/biases: constant block index -> fetched once, resident in VMEM.
                pl.BlockSpec((IN_FEATURES, HIDDEN), lambda i: (0, 0), **resident_kwargs),
                pl.BlockSpec((1, HIDDEN), lambda i: (0, 0), **resident_kwargs),
                pl.BlockSpec((HIDDEN, OUT_PAD), lambda i: (0, 0), **resident_kwargs),
                pl.BlockSpec((1, OUT_PAD), lambda i: (0, 0), **resident_kwargs),
            ],
            out_specs=pl.BlockSpec((tile_b, OUT_PAD), lambda i: (i, 0)),
        ),
        compiler_params=pltpu.CompilerParams(
            dimension_semantics=("parallel",),   # megacore sharding where available
            vmem_limit_bytes=48 << 20,
        ),
    )(x2d_bf16, *params)


def simple_nn_forward(x_nchw, params, *, tile_b=None):
    """Forward matching PyTorch SimpleNN. x_nchw: (N, 3, 32, 32). Returns (N, 10) f32."""
    n = x_nchw.shape[0]
    # == torch x.view(-1, 3072); streamed into the kernel as bf16 (fuses with upstream
    # producers under jit; halves the HBM bytes the kernel reads per row).
    x2d = x_nchw.reshape(n, IN_FEATURES).astype(jnp.bfloat16)

    if tile_b is None:
        tile_b = min(MAX_TILE_B,
                     max(ROW_ALIGN, ((n + ROW_ALIGN - 1) // ROW_ALIGN) * ROW_ALIGN))

    try:
        out_padded = _run_pallas(x2d, params, tile_b, single_buffer_weights=True)
    except Exception:
        # Fallback if this JAX build rejects pl.Buffered(1) on resident operands.
        out_padded = _run_pallas(x2d, params, tile_b, single_buffer_weights=False)

    # Drop the 118 zero-padded logit lanes.
    return out_padded[:, :OUT_FEATURES]


def init_params(key):
    """Deterministic parameter init (PyTorch-default-style uniform bounds)."""
    k1, k2, k3, k4 = jax.random.split(key, 4)
    bound1 = 1.0 / jnp.sqrt(float(IN_FEATURES))
    bound2 = 1.0 / jnp.sqrt(float(HIDDEN))
    w1 = jax.random.uniform(k1, (HIDDEN, IN_FEATURES), jnp.float32, -bound1, bound1)
    b1 = jax.random.uniform(k2, (HIDDEN,), jnp.float32, -bound1, bound1)
    w2 = jax.random.uniform(k3, (OUT_FEATURES, HIDDEN), jnp.float32, -bound2, bound2)
    b2 = jax.random.uniform(k4, (OUT_FEATURES,), jnp.float32, -bound2, bound2)
    return w1, b1, w2, b2


def _reference(x_nchw, w1, b1, w2, b2, bf16_fc1=False):
    x2d = x_nchw.reshape(x_nchw.shape[0], IN_FEATURES)
    if bf16_fc1:
        h = jnp.dot(x2d.astype(jnp.bfloat16), w1.T.astype(jnp.bfloat16),
                    preferred_element_type=jnp.float32) + b1
    else:
        h = x2d @ w1.T + b1
    h = jnp.maximum(h, 0.0)
    return h @ w2.T + b2


if __name__ == "__main__":
    key = jax.random.PRNGKey(0)
    k_x, k_p, k_x2 = jax.random.split(key, 3)

    w1, b1, w2, b2 = init_params(k_p)
    params = prepare_params(w1, b1, w2, b2)   # one-time layout / precision prep

    # Small CIFAR-like batch: (N=2, C=3, H=32, W=32) -> flattens to 3072 features.
    x = jax.random.normal(k_x, (2, 3, 32, 32), dtype=jnp.float32)
    out = simple_nn_forward(x, params)
    jax.block_until_ready(out)
    assert out.shape == (2, OUT_FEATURES)
    # Loose check vs. full-f32 reference (fc1 inputs are streamed in bf16)...
    ref_f32 = _reference(x, w1, b1, w2, b2)
    assert jnp.allclose(out, ref_f32, atol=3e-2, rtol=3e-2)
    # ...and a tight check vs. a bf16-fc1 reference of the same math.
    ref_bf16 = _reference(x, w1, b1, w2, b2, bf16_fc1=True)
    assert jnp.allclose(out, ref_bf16, atol=1e-3, rtol=1e-3)

    # Second case: multi-step grid with a ragged last block (24 rows, tile_b=16),
    # exercising the no-padding cdiv path.
    x2 = jax.random.normal(k_x2, (24, 3, 32, 32), dtype=jnp.float32)
    out2 = simple_nn_forward(x2, params, tile_b=16)
    jax.block_until_ready(out2)
    assert out2.shape == (24, OUT_FEATURES)
    assert jnp.allclose(out2, _reference(x2, w1, b1, w2, b2), atol=3e-2, rtol=3e-2)

    print("KERNEL_OK")
</pallas_src>

<mosaic_0001>
module attributes {stable_mosaic.version = 11 : i64} {
  func.func @mlp_kernel(%arg0: i32, %arg1: memref<16x3072xbf16, #tpu.memory_space<vmem>>, %arg2: memref<3072x128xbf16, #tpu.memory_space<vmem>>, %arg3: memref<1x128xf32, #tpu.memory_space<vmem>>, %arg4: memref<128x128xf32, #tpu.memory_space<vmem>>, %arg5: memref<1x128xf32, #tpu.memory_space<vmem>>, %arg6: memref<16x128xf32, #tpu.memory_space<vmem>>) attributes {dimension_semantics = [#tpu.dimension_semantics<parallel>], iteration_bounds = array<i64: 1>, scalar_prefetch = 0 : i64, scratch_operands = 0 : i64, tpu.core_type = #tpu.core_type<tc>, window_params = [{transform_indices = @transform_0, window_bounds = array<i64: 16, 3072>}, {pipeline_mode = #tpu.pipeline_mode<synchronous>, transform_indices = @transform_1, window_bounds = array<i64: 3072, 128>}, {pipeline_mode = #tpu.pipeline_mode<synchronous>, transform_indices = @transform_2, window_bounds = array<i64: 1, 128>}, {pipeline_mode = #tpu.pipeline_mode<synchronous>, transform_indices = @transform_3, window_bounds = array<i64: 128, 128>}, {pipeline_mode = #tpu.pipeline_mode<synchronous>, transform_indices = @transform_4, window_bounds = array<i64: 1, 128>}, {transform_indices = @transform_5, window_bounds = array<i64: 16, 128>}]} {
    %c0 = arith.constant 0 : index
    %c0_0 = arith.constant 0 : index
    %0 = vector.load %arg1[%c0, %c0_0] : memref<16x3072xbf16, #tpu.memory_space<vmem>>, vector<16x3072xbf16>
    %c0_1 = arith.constant 0 : index
    %c0_2 = arith.constant 0 : index
    %1 = vector.load %arg2[%c0_1, %c0_2] : memref<3072x128xbf16, #tpu.memory_space<vmem>>, vector<3072x128xbf16>
    %cst = arith.constant dense<0.000000e+00> : vector<16x128xf32>
    %2 = tpu.matmul %0, %1, %cst {dimension_numbers = #tpu.dot_dimension_numbers<[1], [0], [0], [1], [0, 0, 1, 1], [], []>} : vector<16x3072xbf16>, vector<3072x128xbf16>, vector<16x128xf32> -> vector<16x128xf32>
    %c0_3 = arith.constant 0 : index
    %c0_4 = arith.constant 0 : index
    %3 = vector.load %arg3[%c0_3, %c0_4] : memref<1x128xf32, #tpu.memory_space<vmem>>, vector<1x128xf32>
    %4 = vector.broadcast %3 : vector<1x128xf32> to vector<16x128xf32>
    %5 = arith.addf %2, %4 : vector<16x128xf32>
    %cst_5 = arith.constant 0.000000e+00 : f32
    %6 = vector.broadcast %cst_5 : f32 to vector<16x128xf32>
    %7 = arith.maximumf %5, %6 : vector<16x128xf32>
    %c0_6 = arith.constant 0 : index
    %c0_7 = arith.constant 0 : index
    %8 = vector.load %arg4[%c0_6, %c0_7] : memref<128x128xf32, #tpu.memory_space<vmem>>, vector<128x128xf32>
    %cst_8 = arith.constant dense<0.000000e+00> : vector<16x128xf32>
    %9 = tpu.matmul %7, %8, %cst_8 {dimension_numbers = #tpu.dot_dimension_numbers<[1], [0], [0], [1], [0, 0, 1, 1], [], []>} : vector<16x128xf32>, vector<128x128xf32>, vector<16x128xf32> -> vector<16x128xf32>
    %c0_9 = arith.constant 0 : index
    %c0_10 = arith.constant 0 : index
    %10 = vector.load %arg5[%c0_9, %c0_10] : memref<1x128xf32, #tpu.memory_space<vmem>>, vector<1x128xf32>
    %11 = vector.broadcast %10 : vector<1x128xf32> to vector<16x128xf32>
    %12 = arith.addf %9, %11 : vector<16x128xf32>
    %c0_11 = arith.constant 0 : index
    %c0_12 = arith.constant 0 : index
    %13 = vector.load %arg6[%c0_11, %c0_12] : memref<16x128xf32, #tpu.memory_space<vmem>>, vector<16x128xf32>
    tpu.vector_store %arg6[%c0_11, %c0_12], %12 {strides = array<i32>} : memref<16x128xf32, #tpu.memory_space<vmem>>, vector<16x128xf32>,
    return
  }
  func.func @transform_0(%arg0: i32) -> (i32, i32) {
    %c0_i32 = arith.constant 0 : i32
    %c0_i32_0 = arith.constant 0 : i32
    return %arg0, %c0_i32 : i32, i32
  }
  func.func @transform_1(%arg0: i32) -> (i32, i32) {
    %c0_i32 = arith.constant 0 : i32
    %c0_i32_0 = arith.constant 0 : i32
    %c0_i32_1 = arith.constant 0 : i32
    return %c0_i32, %c0_i32_0 : i32, i32
  }
  func.func @transform_2(%arg0: i32) -> (i32, i32) {
    %c0_i32 = arith.constant 0 : i32
    %c0_i32_0 = arith.constant 0 : i32
    %c0_i32_1 = arith.constant 0 : i32
    return %c0_i32, %c0_i32_0 : i32, i32
  }
  func.func @transform_3(%arg0: i32) -> (i32, i32) {
    %c0_i32 = arith.constant 0 : i32
    %c0_i32_0 = arith.constant 0 : i32
    %c0_i32_1 = arith.constant 0 : i32
    return %c0_i32, %c0_i32_0 : i32, i32
  }
  func.func @transform_4(%arg0: i32) -> (i32, i32) {
    %c0_i32 = arith.constant 0 : i32
    %c0_i32_0 = arith.constant 0 : i32
    %c0_i32_1 = arith.constant 0 : i32
    return %c0_i32, %c0_i32_0 : i32, i32
  }
  func.func @transform_5(%arg0: i32) -> (i32, i32) {
    %c0_i32 = arith.constant 0 : i32
    %c0_i32_0 = arith.constant 0 : i32
    return %arg0, %c0_i32 : i32, i32
  }
}

module attributes {stable_mosaic.version = 11 : i64} {
  func.func @mlp_kernel(%arg0: i32, %arg1: memref<16x3072xbf16, #tpu.memory_space<vmem>>, %arg2: memref<3072x128xbf16, #tpu.memory_space<vmem>>, %arg3: memref<1x128xf32, #tpu.memory_space<vmem>>, %arg4: memref<128x128xf32, #tpu.memory_space<vmem>>, %arg5: memref<1x128xf32, #tpu.memory_space<vmem>>, %arg6: memref<16x128xf32, #tpu.memory_space<vmem>>) attributes {dimension_semantics = [#tpu.dimension_semantics<parallel>], iteration_bounds = array<i64: 1>, scalar_prefetch = 0 : i64, scratch_operands = 0 : i64, tpu.core_type = #tpu.core_type<tc>, window_params = [{transform_indices = @transform_0, window_bounds = array<i64: 16, 3072>}, {pipeline_mode = #tpu.pipeline_mode<synchronous>, transform_indices = @transform_1, window_bounds = array<i64: 3072, 128>}, {pipeline_mode = #tpu.pipeline_mode<synchronous>, transform_indices = @transform_2, window_bounds = array<i64: 1, 128>}, {pipeline_mode = #tpu.pipeline_mode<synchronous>, transform_indices = @transform_3, window_bounds = array<i64: 128, 128>}, {pipeline_mode = #tpu.pipeline_mode<synchronous>, transform_indices = @transform_4, window_bounds = array<i64: 1, 128>}, {transform_indices = @transform_5, window_bounds = array<i64: 16, 128>}]} {
    %c0 = arith.constant 0 : index
    %c0_0 = arith.constant 0 : index
    %0 = vector.load %arg1[%c0, %c0_0] : memref<16x3072xbf16, #tpu.memory_space<vmem>>, vector<16x3072xbf16>
    %c0_1 = arith.constant 0 : index
    %c0_2 = arith.constant 0 : index
    %1 = vector.load %arg2[%c0_1, %c0_2] : memref<3072x128xbf16, #tpu.memory_space<vmem>>, vector<3072x128xbf16>
    %cst = arith.constant dense<0.000000e+00> : vector<16x128xf32>
    %2 = tpu.matmul %0, %1, %cst {dimension_numbers = #tpu.dot_dimension_numbers<[1], [0], [0], [1], [0, 0, 1, 1], [], []>} : vector<16x3072xbf16>, vector<3072x128xbf16>, vector<16x128xf32> -> vector<16x128xf32>
    %c0_3 = arith.constant 0 : index
    %c0_4 = arith.constant 0 : index
    %3 = vector.load %arg3[%c0_3, %c0_4] : memref<1x128xf32, #tpu.memory_space<vmem>>, vector<1x128xf32>
    %4 = vector.broadcast %3 : vector<1x128xf32> to vector<16x128xf32>
    %5 = arith.addf %2, %4 : vector<16x128xf32>
    %cst_5 = arith.constant 0.000000e+00 : f32
    %6 = vector.broadcast %cst_5 : f32 to vector<16x128xf32>
    %7 = arith.maximumf %5, %6 : vector<16x128xf32>
    %c0_6 = arith.constant 0 : index
    %c0_7 = arith.constant 0 : index
    %8 = vector.load %arg4[%c0_6, %c0_7] : memref<128x128xf32, #tpu.memory_space<vmem>>, vector<128x128xf32>
    %cst_8 = arith.constant dense<0.000000e+00> : vector<16x128xf32>
    %9 = tpu.matmul %7, %8, %cst_8 {dimension_numbers = #tpu.dot_dimension_numbers<[1], [0], [0], [1], [0, 0, 1, 1], [], []>} : vector<16x128xf32>, vector<128x128xf32>, vector<16x128xf32> -> vector<16x128xf32>
    %c0_9 = arith.constant 0 : index
    %c0_10 = arith.constant 0 : index
    %10 = vector.load %arg5[%c0_9, %c0_10] : memref<1x128xf32, #tpu.memory_space<vmem>>, vector<1x128xf32>
    %11 = vector.broadcast %10 : vector<1x128xf32> to vector<16x128xf32>
    %12 = arith.addf %9, %11 : vector<16x128xf32>
    %c0_11 = arith.constant 0 : index
    %c0_12 = arith.constant 0 : index
    %13 = vector.load %arg6[%c0_11, %c0_12] : memref<16x128xf32, #tpu.memory_space<vmem>>, vector<16x128xf32>
    tpu.vector_store %arg6[%c0_11, %c0_12], %12 {strides = array<i32>} : memref<16x128xf32, #tpu.memory_space<vmem>>, vector<16x128xf32>,
    return
  }
  func.func @transform_0(%arg0: i32) -> (i32, i32) {
    %c0_i32 = arith.constant 0 : i32
    %c0_i32_0 = arith.constant 0 : i32
    return %arg0, %c0_i32 : i32, i32
  }
  func.func @transform_1(%arg0: i32) -> (i32, i32) {
    %c0_i32 = arith.constant 0 : i32
    %c0_i32_0 = arith.constant 0 : i32
    %c0_i32_1 = arith.constant 0 : i32
    return %c0_i32, %c0_i32_0 : i32, i32
  }
  func.func @transform_2(%arg0: i32) -> (i32, i32) {
    %c0_i32 = arith.constant 0 : i32
    %c0_i32_0 = arith.constant 0 : i32
    %c0_i32_1 = arith.constant 0 : i32
    return %c0_i32, %c0_i32_0 : i32, i32
  }
  func.func @transform_3(%arg0: i32) -> (i32, i32) {
    %c0_i32 = arith.constant 0 : i32
    %c0_i32_0 = arith.constant 0 : i32
    %c0_i32_1 = arith.constant 0 : i32
    return %c0_i32, %c0_i32_0 : i32, i32
  }
  func.func @transform_4(%arg0: i32) -> (i32, i32) {
    %c0_i32 = arith.constant 0 : i32
    %c0_i32_0 = arith.constant 0 : i32
    %c0_i32_1 = arith.constant 0 : i32
    return %c0_i32, %c0_i32_0 : i32, i32
  }
  func.func @transform_5(%arg0: i32) -> (i32, i32) {
    %c0_i32 = arith.constant 0 : i32
    %c0_i32_0 = arith.constant 0 : i32
    return %arg0, %c0_i32 : i32, i32
  }
}

</mosaic_0001>

<bundles_post_ra>
// kernel: tpu_custom_call.1
= control target key start
LH: loop header
LB: loop body
LE: loop exit
PB: predicated region body
PF: predicated region fallthrough
CT: control target
= control target key end

     0   :  { %10 = vsyncpa [#allocation3], 0  ;;  %s3663_s0 = inlined_call_operand.hbm [shape: bf16[2,3072], index: 0, kind: input, shape index: {}]   ;;  %s3664_s1 = inlined_call_operand.hbm [shape: bf16[3072,128], index: 1, kind: input, shape index: {}]   ;;  %s3665_s2 = inlined_call_operand.vmem [shape: f32[1,128], index: 2, kind: input, shape index: {}]   ;;  %s3666_s3 = inlined_call_operand.hbm [shape: f32[128,128], index: 3, kind: input, shape index: {}]   ;;  %s3667_s4 = inlined_call_operand.vmem [shape: f32[1,128], index: 4, kind: input, shape index: {}]   ;;  %s3668_s5 = inlined_call_operand.hbm [shape: f32[2,128], index: 5, kind: output, shape index: {}]  }
   0x1   :  { %11 = vsyncpa [#allocation6], 0 }
   0x2   :  { %12 = vsyncpa [#allocation4], 0 }
   0x3   :  { %17 = vsyncadd [#allocation3], 2688  ;;  %s3536_s18 = smov [#allocation5]  }
   0x4   :  { %s30_s19 = sshll.u32 %s3536_s18, 4  ;;  %s31_s19 = int_to_ptr.vmem [resolvable:$true] %s30_s19 }
   0x5   :  { %s3458_s20 = scalar_lea.vmem %s31_s19, 24576  ;;  %p3463_p1 = scmp.lt.s32.totalorder %s31_s19, %s31_s19 }
   0x6   :  { %p3459_p0 = scmp.ne.s32.totalorder %s31_s19, %s3458_s20  ;;  %p3464_p2 = scmp.lt.s32.totalorder %s3458_s20, %s3458_s20 }
   0x8   :  { %p3465_p3 = por %p3464_p2, %p3463_p1 }
   0xa   :  { %p3466_p4 = pnand %p3465_p3, %p3459_p0 }
   0xc   :  { %3469 = shalt.err (!%p3466_p4)
}
   0xd   :  { %s3537_s21 = smov 64   ;;  %s3538_s22 = smov 4  }
   0xe   :  { %36 = dma.hbm_to_vmem [thread:$0]  %s3664_s1, 24576, %s31_s19, [#allocation6], %s3537_s21, %s3537_s21, %s3538_s22  }
   0xf   :  { %s3539_s25 = smov [#allocation2]  }
  0x10   :  { %s18_s26 = sshll.u32 %s3539_s25, 4  ;;  %s19_s26 = int_to_ptr.vmem [resolvable:$true] %s18_s26 }
  0x11   :  { %s3478_s27 = scalar_lea.vmem %s19_s26, 384  ;;  %s3482_s28 = scalar_lea.vmem %s19_s26, 3072 }
  0x12   :  { %p3479_p5 = scmp.ne.s32.totalorder %s19_s26, %s3478_s27  ;;  %p3483_p6 = scmp.lt.s32.totalorder %s19_s26, %s19_s26 }
  0x13   :  { %p3484_p7 = scmp.lt.s32.totalorder %s3482_s28, %s3478_s27 }
  0x15   :  { %p3485_p8 = por %p3484_p7, %p3483_p6 }
  0x17   :  { %p3486_p9 = pnand %p3485_p8, %p3479_p5 }
  0x19   :  { %3489 = shalt.err (!%p3486_p9)
}
  0x1a   :  { %s3540_s29 = smov 384   ;;  %s3541_s30 = smov 24  }
  0x1b   :  { %24 = dma.hbm_to_vmem [thread:$0]  %s3663_s0, 384, %s19_s26, [#allocation3], %s3540_s29, %s3540_s29, %s3541_s30  }
  0x1c   :  { %s3542_s8 = smov [#allocation7]  }
  0x1d   :  { %s44_s9 = sshll.u32 %s3542_s8, 4  ;;  %s45_s9 = int_to_ptr.vmem [resolvable:$true] %s44_s9 }
  0x1e   :  { %s3498_s1 = scalar_lea.vmem %s45_s9, 2048  ;;  %p3503_p11 = scmp.lt.s32.totalorder %s45_s9, %s45_s9 }
  0x1f   :  { %p3499_p10 = scmp.ne.s32.totalorder %s45_s9, %s3498_s1  ;;  %p3504_p12 = scmp.lt.s32.totalorder %s3498_s1, %s3498_s1 }
  0x21   :  { %p3505_p13 = por %p3504_p12, %p3503_p11 }
  0x23   :  { %p3506_p0 = pnand %p3505_p13, %p3499_p10 }
  0x25   :  { %3509 = shalt.err (!%p3506_p0)
}
  0x26   :  { %s3543_s10 = smov 128   ;;  %s3544_s11 = smov 8  }
  0x27   :  { %50 = dma.hbm_to_vmem [thread:$0]  %s3666_s3, 2048, %s45_s9, [#allocation6], %s3543_s10, %s3543_s10, %s3544_s11  }
  0x28   :  { %3530 = dma.done.wait [#allocation3], 3072  }
  0x29   :  { %3531 = vsyncadd [#allocation3], 4294964224 }
  0x2a   :  { %3532 = dma.done.wait [#allocation6], 26624  }
  0x2b   :  { %3533 = vsyncadd [#allocation6], 4294940672  ;;  %v3222_v0 = vld [vmem:[#allocation5 + $0x78] sm:$0xff]   ;;  %v3226_v4 = vld [vmem:[#allocation5 + $0x70] sm:$0xff]   ;;  %v3545_v25 = vmov 1966171168   ;;  %v513_v27 = vlaneseq }
  0x2c   :  { %v3223_v1 = vld [vmem:[#allocation5 + $0xf8] sm:$0xff]   ;;  %2892 = vmatprep.subr.bf16.mxu0 %v3222_v0  ;;  %v3227_v5 = vld [vmem:[#allocation5 + $0xf0] sm:$0xff]   ;;  %v3230_v8 = vld [vmem:[#allocation5 + $0x68] sm:$0xff]   ;;  %v511_v26 = vunpack.c.l.s4 %v3545_v25 }
  0x2d   :  { %v3224_v2 = vld [vmem:[#allocation5 + $0x38] sm:$0xff]   ;;  %2914 = vmatprep.subr.bf16.mxu1 %v3223_v1  ;;  %v3228_v6 = vld [vmem:[#allocation5 + $0x30] sm:$0xff]   ;;  %v3231_v9 = vld [vmem:[#allocation5 + $0xe8] sm:$0xff]   ;;  %v514_v33 = vshrl.u32 %v513_v27, 7 }
  0x2e   :  { %v3225_v3 = vld [vmem:[#allocation5 + $0xb8] sm:$0xff]   ;;  %2893 = vmatpush3.bf16.msra.mxu0 %v3224_v2  ;;  %v3229_v7 = vld [vmem:[#allocation5 + $0xb0] sm:$0xff]   ;;  %v3232_v10 = vld [vmem:[#allocation5 + $0x28] sm:$0xff]   ;;  %v512_v32 = vunpack.c.0.s8 %v511_v26 }
  0x2f   :  { %2915 = vmatpush3.bf16.msra.mxu1 %v3225_v3  ;;  %2894 = vmatprep.subr.bf16.mxu0 %v3226_v4  ;;  %v3233_v11 = vld [vmem:[#allocation5 + $0xa8] sm:$0xff]   ;;  %v3234_v12 = vld [vmem:[#allocation5 + $0x60] sm:$0xff]   ;;  %v3238_v16 = vld [vmem:[#allocation5 + $0x58] sm:$0xff]  }
  0x30   :  { %2916 = vmatprep.subr.bf16.mxu1 %v3227_v5  ;;  %v3235_v13 = vld [vmem:[#allocation5 + $0xe0] sm:$0xff]   ;;  %v3239_v17 = vld [vmem:[#allocation5 + $0xd8] sm:$0xff]   ;;  %v3242_v20 = vld [vmem:[#allocation5 + $0x50] sm:$0xff]   ;;  %v3588_v37 = vsub.s32 %v512_v32, %v514_v33 }
  0x31   :  { %v3236_v14 = vld [vmem:[#allocation5 + $0x20] sm:$0xff]   ;;  %v3240_v18 = vld [vmem:[#allocation5 + $0x18] sm:$0xff]   ;;  %v3243_v21 = vld [vmem:[#allocation5 + $0xd0] sm:$0xff]  }
  0x32   :  { %2895 = vmatpush3.bf16.msra.mxu0 %v3228_v6  ;;  %v3237_v15 = vld [vmem:[#allocation5 + $0xa0] sm:$0xff]   ;;  %v3241_v19 = vld [vmem:[#allocation5 + $0x98] sm:$0xff]   ;;  %v3244_v22 = vld [vmem:[#allocation5 + $0x10] sm:$0xff]  }
  0x33   :  { %2917 = vmatpush3.bf16.msra.mxu1 %v3229_v7  ;;  %2896 = vmatprep.subr.bf16.mxu0 %v3230_v8  ;;  %v3245_v23 = vld [vmem:[#allocation5 + $0x90] sm:$0xff]   ;;  %v3246_v24 = vld [vmem:[#allocation5 + $0x48] sm:$0xff]   ;;  %v3250_v31 = vld [vmem:[#allocation5 + $0x40] sm:$0xff]  }
  0x34   :  { %2918 = vmatprep.subr.bf16.mxu1 %v3231_v9  ;;  %v3247_v28 = vld [vmem:[#allocation5 + $0xc8] sm:$0xff]   ;;  %v3251_v34 = vld [vmem:[#allocation5 + $0xc0] sm:$0xff]   ;;  %v3266_v52 = vld [vmem:[#allocation5 + $0x178] sm:$0xff]  }
  0x35   :  { %v3248_v29 = vld [vmem:[#allocation5 + $0x8] sm:$0xff]   ;;  %v3252_v35 = vld [vmem:[#allocation5] sm:$0xff]   ;;  %v3267_v56 = vld [vmem:[#allocation5 + $0x1f8] sm:$0xff]  }
  0x36   :  { %2897 = vmatpush3.bf16.msra.mxu0 %v3232_v10  ;;  %v3249_v30 = vld [vmem:[#allocation5 + $0x88] sm:$0xff]   ;;  %v3253_v36 = vld [vmem:[#allocation5 + $0x80] sm:$0xff]   ;;  %v3268_v2 = vld [vmem:[#allocation5 + $0x138] sm:$0xff]  }
  0x37   :  { %2919 = vmatpush3.bf16.msra.mxu1 %v3233_v11  ;;  %2898 = vmatprep.subr.bf16.mxu0 %v3234_v12  ;;  %v3254_v38 = vld [vmem:[#allocation2] ss:$24 sps:$4 sm:$0xff]   ;;  %v3256_v39 = vld [vmem:[#allocation2 + $0x4] ss:$24 sps:$4 sm:$0xff]   ;;  %v3257_v40 = vld [vmem:[#allocation2 + $0x30] ss:$24 sps:$4 sm:$0xff]  }
  0x38   :  { %2920 = vmatprep.subr.bf16.mxu1 %v3235_v13  ;;  %v3259_v41 = vld [vmem:[#allocation2 + $0x34] ss:$24 sps:$4 sm:$0xff]   ;;  %v3260_v42 = vld [vmem:[#allocation2 + $0x60] ss:$24 sps:$4 sm:$0xff]   ;;  %v3262_v43 = vld [vmem:[#allocation2 + $0x64] ss:$24 sps:$4 sm:$0xff]   ;;  %v516_v45 = vrot.slane %v3254_v38, %v3588_v37  ;;  %v530_v47 = vrot.slane %v3257_v40, %v3588_v37  ;;  %v3593_v48 = vrot.slane %v3256_v39, %v3588_v37 }
  0x39   :  { %v3263_v44 = vld [vmem:[#allocation2 + $0x90] ss:$24 sps:$4 sm:$0xff]   ;;  %v3265_v46 = vld [vmem:[#allocation2 + $0x94] ss:$24 sps:$4 sm:$0xff]   ;;  %v3596_v49 = vrot.slane %v3259_v41, %v3588_v37  ;;  %v544_v50 = vrot.slane %v3260_v42, %v3588_v37  ;;  %v3601_v53 = vrot.slane %v3262_v43, %v3588_v37  ;;  %v3269_v4 = vld [vmem:[#allocation5 + $0x1b8] sm:$0xff]  }
  0x3a   :  { %2899 = vmatpush3.bf16.msra.mxu0 %v3236_v14  ;;  %v558_v51 = vrot.slane %v3263_v44, %v3588_v37  ;;  %v567_v54 = vcombine.high %v516_v45, %v530_v47  ;;  %v566_v55 = vcombine.low %v516_v45, %v530_v47  ;;  %v3604_v57 = vrot.slane %v3265_v46, %v3588_v37  ;;  %v3270_v10 = vld [vmem:[#allocation5 + $0x170] sm:$0xff]   ;;  %v3283_v25 = vld [vmem:[#allocation5 + $0x1d8] sm:$0xff]   ;;  %v3290_v32 = vld [vmem:[#allocation5 + $0x148] sm:$0xff]  }
  0x3b   :  { %2921 = vmatpush3.bf16.msra.mxu1 %v3237_v15  ;;  %2900 = vmatprep.subr.bf16.mxu0 %v3238_v16  ;;  %v569_v58 = vcombine.high %v3593_v48, %v3596_v49  ;;  %v3271_v11 = vld [vmem:[#allocation5 + $0x1f0] sm:$0xff]   ;;  %v3274_v16 = vld [vmem:[#allocation5 + $0x168] sm:$0xff]   ;;  %v3284_v26 = vld [vmem:[#allocation5 + $0x118] sm:$0xff]  }
  0x3c   :  { %2922 = vmatprep.subr.bf16.mxu1 %v3239_v17  ;;  %v571_v59 = vcombine.high %v544_v50, %v558_v51  ;;  %v570_v60 = vcombine.low %v544_v50, %v558_v51  ;;  %v594_v61 = vrot.slane %v567_v54, %v3588_v37  ;;  %v580_v62 = vrot.slane %v566_v55, %v3588_v37  ;;  %v3272_v12 = vld [vmem:[#allocation5 + $0x130] sm:$0xff]   ;;  %v3275_v17 = vld [vmem:[#allocation5 + $0x1e8] sm:$0xff]   ;;  %v3285_v27 = vld [vmem:[#allocation5 + $0x198] sm:$0xff]  }
  0x3d   :  { %v573_v63 = vcombine.high %v3601_v53, %v3604_v57  ;;  %v601_v3 = vrot.slane %v569_v58, %v3588_v37  ;;  %v3273_v15 = vld [vmem:[#allocation5 + $0x1b0] sm:$0xff]   ;;  %v3291_v33 = vld [vmem:[#allocation5 + $0x1c8] sm:$0xff]   ;;  %v572_v38 = vcombine.low %v3601_v53, %v3604_v57  ;;  %v3294_v39 = vld [vmem:[#allocation5 + $0x140] sm:$0xff]  }
  0x3e   :  { %2901 = vmatpush3.bf16.msra.mxu0 %v3240_v18  ;;  %v622_v0 = vrot.slane %v571_v59, %v3588_v37  ;;  %v608_v1 = vrot.slane %v570_v60, %v3588_v37  ;;  %v3276_v18 = vld [vmem:[#allocation5 + $0x128] sm:$0xff]   ;;  %v3295_v40 = vld [vmem:[#allocation5 + $0x1c0] sm:$0xff]   ;;  %v3298_v45 = vld [vmem:[#allocation5 + $0x278] sm:$0xff]  }
  0x3f   :  { %2923 = vmatpush3.bf16.msra.mxu1 %v3241_v19  ;;  %2902 = vmatprep.subr.bf16.mxu0 %v3242_v20  ;;  %v629_v5 = vrot.slane %v573_v63, %v3588_v37  ;;  %v3277_v19 = vld [vmem:[#allocation5 + $0x1a8] sm:$0xff]   ;;  %v3278_v20 = vld [vmem:[#allocation5 + $0x160] sm:$0xff]   ;;  %v615_v44 = vrot.slane %v572_v38, %v3588_v37  ;;  %v3299_v46 = vld [vmem:[#allocation5 + $0x2f8] sm:$0xff]  }
  0x40   :  { %2924 = vmatprep.subr.bf16.mxu1 %v3243_v21  ;;  %v634_v6 = vcombine.low %v594_v61, %v622_v0  ;;  %v635_v7 = vcombine.high %v594_v61, %v622_v0  ;;  %v630_v8 = vcombine.low %v580_v62, %v608_v1  ;;  %v631_v9 = vcombine.high %v580_v62, %v608_v1  ;;  %v3279_v21 = vld [vmem:[#allocation5 + $0x1e0] sm:$0xff]   ;;  %v3300_v47 = vld [vmem:[#allocation5 + $0x238] sm:$0xff]   ;;  %v3302_v51 = vld [vmem:[#allocation5 + $0x270] sm:$0xff]  }
  0x41   :  { %v636_v13 = vcombine.low %v601_v3, %v629_v5  ;;  %v637_v14 = vcombine.high %v601_v3, %v629_v5  ;;  %v3296_v41 = vld [vmem:[#allocation5 + $0x100] sm:$0xff]   ;;  %v3301_v50 = vld [vmem:[#allocation5 + $0x2b8] sm:$0xff]   ;;  %v3304_v53 = vld [vmem:[#allocation5 + $0x230] sm:$0xff]  }
  0x42   :  { %2903 = vmatpush3.bf16.msra.mxu0 %v3244_v22  ;;  %2118 = vmatprep.mubr.bf16.mxu0 %v634_v6  ;;  %v3280_v22 = vld [vmem:[#allocation5 + $0x120] sm:$0xff]   ;;  %v3305_v54 = vld [vmem:[#allocation5 + $0x2b0] sm:$0xff]   ;;  %v3306_v55 = vld [vmem:[#allocation5 + $0x268] sm:$0xff]  }
  0x43   :  { %2925 = vmatpush3.bf16.msra.mxu1 %v3245_v23  ;;  %2904 = vmatprep.subr.bf16.mxu0 %v3246_v24  ;;  %v3281_v23 = vld [vmem:[#allocation5 + $0x1a0] sm:$0xff]   ;;  %v3282_v24 = vld [vmem:[#allocation5 + $0x158] sm:$0xff]   ;;  %v3308_v57 = vld [vmem:[#allocation5 + $0x228] sm:$0xff]  }
  0x44   :  { %2926 = vmatprep.subr.bf16.mxu1 %v3247_v28  ;;  %2159 = vmatprep.mubr.bf16.mxu1 %v635_v7  ;;  %v3286_v28 = vld [vmem:[#allocation5 + $0x150] sm:$0xff]   ;;  %v3297_v42 = vld [vmem:[#allocation5 + $0x180] sm:$0xff]   ;;  %v3309_v58 = vld [vmem:[#allocation5 + $0x2a8] sm:$0xff]  }
  0x45   :  { %v3310_v59 = vld [vmem:[#allocation5 + $0x260] sm:$0xff]   ;;  %v3314_v63 = vld [vmem:[#allocation5 + $0x258] sm:$0xff]   ;;  %v3318_v3 = vld [vmem:[#allocation5 + $0x250] sm:$0xff]  }
  0x46   :  { %2905 = vmatpush3.bf16.msra.mxu0 %v3248_v29  ;;  %v3287_v29 = vld [vmem:[#allocation5 + $0x1d0] sm:$0xff]   ;;  %v3311_v60 = vld [vmem:[#allocation5 + $0x2e0] sm:$0xff]   ;;  %v3315_v0 = vld [vmem:[#allocation5 + $0x2d8] sm:$0xff]  }
  0x47   :  { %2927 = vmatpush3.bf16.msra.mxu1 %v3249_v30  ;;  %2906 = vmatprep.subr.bf16.mxu0 %v3250_v31  ;;  %v3288_v30 = vld [vmem:[#allocation5 + $0x110] sm:$0xff]   ;;  %v3312_v61 = vld [vmem:[#allocation5 + $0x220] sm:$0xff]   ;;  %v3316_v1 = vld [vmem:[#allocation5 + $0x218] sm:$0xff]  }
  0x48   :  { %2928 = vmatprep.subr.bf16.mxu1 %v3251_v34  ;;  %v3289_v31 = vld [vmem:[#allocation5 + $0x190] sm:$0xff]   ;;  %v3292_v34 = vld [vmem:[#allocation5 + $0x108] sm:$0xff]   ;;  %v3313_v62 = vld [vmem:[#allocation5 + $0x2a0] sm:$0xff]  }
  0x49   :  { %v3320_v5 = vld [vmem:[#allocation5 + $0x210] sm:$0xff]   ;;  %v3322_v7 = vld [vmem:[#allocation5 + $0x248] sm:$0xff]  }
  0x4a   :  { %2907 = vmatpush3.bf16.msra.mxu0 %v3252_v35  ;;  %v3293_v35 = vld [vmem:[#allocation5 + $0x188] sm:$0xff]   ;;  %v3321_v6 = vld [vmem:[#allocation5 + $0x290] sm:$0xff]  }
  0x4b   :  { %2929 = vmatpush3.bf16.msra.mxu1 %v3253_v36  ;;  %2936 = vmatprep.subr.bf16.mxu0 %v3266_v52  ;;  %v568_v36 = vcombine.low %v3593_v48, %v3596_v49  ;;  %v3303_v52 = vld [vmem:[#allocation5 + $0x2f0] sm:$0xff]  }
  0x4c   :  { %2958 = vmatprep.subr.bf16.mxu1 %v3267_v56  ;;  %v3307_v56 = vld [vmem:[#allocation5 + $0x2e8] sm:$0xff]  }
  0x4d   :  { %2119 = vmatmul.mubr.bf16.vlgmr.msra.gmra.mxu0 %v630_v8  ;;  %v587_v43 = vrot.slane %v568_v36, %v3588_v37  ;;  %v3323_v8 = vld [vmem:[#allocation5 + $0x2c8] sm:$0xff]  }
  0x4e   :  { %2160 = vmatmul.mubr.bf16.vlgmr.msra.gmra.mxu1 %v631_v9  ;;  %2937 = vmatpush3.bf16.msra.mxu0 %v3268_v2  ;;  %v3317_v2 = vld [vmem:[#allocation5 + $0x298] sm:$0xff]   ;;  %v3324_v9 = vld [vmem:[#allocation5 + $0x208] sm:$0xff]  }
  0x4f   :  { %2959 = vmatpush3.bf16.msra.mxu1 %v3269_v4  ;;  %2938 = vmatprep.subr.bf16.mxu0 %v3270_v10  ;;  %v632_v48 = vcombine.low %v587_v43, %v615_v44  ;;  %v633_v49 = vcombine.high %v587_v43, %v615_v44  ;;  %v3319_v4 = vld [vmem:[#allocation5 + $0x2d0] sm:$0xff]   ;;  %v3325_v10 = vld [vmem:[#allocation5 + $0x288] sm:$0xff]  }
  0x50   :  { %2960 = vmatprep.subr.bf16.mxu1 %v3271_v11  ;;  %2200 = vmatprep.mubr.bf16.mxu0 %v636_v13  ;;  %v3326_v11 = vld [vmem:[#allocation5 + $0x240] sm:$0xff]   ;;  %v3345_v43 = vld [vmem:[#allocation5 + $0x3b0] sm:$0xff]   ;;  %v3346_v44 = vld [vmem:[#allocation5 + $0x368] sm:$0xff]  }
  0x51   :  { %2241 = vmatprep.mubr.bf16.mxu1 %v637_v14  ;;  %v3328_v13 = vld [vmem:[#allocation5 + $0x200] sm:$0xff]  }
  0x52   :  { %2939 = vmatpush3.bf16.msra.mxu0 %v3272_v12  ;;  %v3327_v12 = vld [vmem:[#allocation5 + $0x2c0] sm:$0xff]  }
  0x53   :  { %2961 = vmatpush3.bf16.msra.mxu1 %v3273_v15  ;;  %2940 = vmatprep.subr.bf16.mxu0 %v3274_v16  ;;  %v3329_v14 = vld [vmem:[#allocation5 + $0x280] sm:$0xff]   ;;  %v3332_v16 = vld [vmem:[#allocation2 + $0x38] ss:$24 sps:$4 sm:$0xff]  }
  0x54   :  { %2962 = vmatprep.subr.bf16.mxu1 %v3275_v17  ;;  %v3330_v15 = vld [vmem:[#allocation2 + $0x8] ss:$24 sps:$4 sm:$0xff]  }
  0x55   :  { %v3334_v17 = vld [vmem:[#allocation2 + $0x68] ss:$24 sps:$4 sm:$0xff]  }
  0x56   :  { %2941 = vmatpush3.bf16.msra.mxu0 %v3276_v18  ;;  %v3336_v18 = vld [vmem:[#allocation2 + $0x98] ss:$24 sps:$4 sm:$0xff]  }
  0x57   :  { %2963 = vmatpush3.bf16.msra.mxu1 %v3277_v19  ;;  %2942 = vmatprep.subr.bf16.mxu0 %v3278_v20  ;;  %v652_v19 = vrot.slane %v3330_v15, %v3588_v37  ;;  %v666_v20 = vrot.slane %v3332_v16, %v3588_v37  ;;  %v3374_v16 = vld [vmem:[#allocation5 + $0x478] sm:$0xff]  }
  0x58   :  { %2964 = vmatprep.subr.bf16.mxu1 %v3279_v21  ;;  %v680_v21 = vrot.slane %v3334_v17, %v3588_v37 }
  0x5a   :  { %2943 = vmatpush3.bf16.msra.mxu0 %v3280_v22  ;;  %v3338_v22 = vld [vmem:[#allocation5 + $0x378] sm:$0xff]  }
  0x5b   :  { %2965 = vmatpush3.bf16.msra.mxu1 %v3281_v23  ;;  %2944 = vmatprep.subr.bf16.mxu0 %v3282_v24  ;;  %v694_v23 = vrot.slane %v3336_v18, %v3588_v37  ;;  %v3339_v24 = vld [vmem:[#allocation5 + $0x3f8] sm:$0xff]  }
  0x5c   :  { %2966 = vmatprep.subr.bf16.mxu1 %v3283_v25  ;;  %v703_v25 = vcombine.high %v652_v19, %v666_v20 }
  0x5e   :  { %2945 = vmatpush3.bf16.msra.mxu0 %v3284_v26  ;;  %v702_v26 = vcombine.low %v652_v19, %v666_v20  ;;  %v3375_v19 = vld [vmem:[#allocation5 + $0x4f8] sm:$0xff]  }
  0x5f   :  { %2967 = vmatpush3.bf16.msra.mxu1 %v3285_v27  ;;  %2946 = vmatprep.subr.bf16.mxu0 %v3286_v28  ;;  %v707_v27 = vcombine.high %v680_v21, %v694_v23  ;;  %v706_v28 = vcombine.low %v680_v21, %v694_v23  ;;  %v3377_v23 = vld [vmem:[#allocation5 + $0x4b8] sm:$0xff]  }
  0x60   :  { %2968 = vmatprep.subr.bf16.mxu1 %v3287_v29  ;;  %v730_v29 = vrot.slane %v703_v25, %v3588_v37 }
  0x62   :  { %2947 = vmatpush3.bf16.msra.mxu0 %v3288_v30  ;;  %v716_v30 = vrot.slane %v702_v26, %v3588_v37 }
  0x63   :  { %2969 = vmatpush3.bf16.msra.mxu1 %v3289_v31  ;;  %2948 = vmatprep.subr.bf16.mxu0 %v3290_v32  ;;  %v758_v31 = vrot.slane %v707_v27, %v3588_v37  ;;  %v744_v32 = vrot.slane %v706_v28, %v3588_v37  ;;  %v3378_v28 = vld [vmem:[#allocation5 + $0x470] sm:$0xff]  }
  0x64   :  { %2970 = vmatprep.subr.bf16.mxu1 %v3291_v33  ;;  %v3340_v33 = vld [vmem:[#allocation5 + $0x338] sm:$0xff]  }
  0x65   :  { %v771_v36 = vcombine.high %v730_v29, %v758_v31  ;;  %v766_v38 = vcombine.low %v716_v30, %v744_v32 }
  0x66   :  { %2949 = vmatpush3.bf16.msra.mxu0 %v3292_v34  ;;  %v3341_v34 = vld [vmem:[#allocation5 + $0x3b8] sm:$0xff]  }
  0x67   :  { %2971 = vmatpush3.bf16.msra.mxu1 %v3293_v35  ;;  %2950 = vmatprep.subr.bf16.mxu0 %v3294_v39  ;;  %v770_v35 = vcombine.low %v730_v29, %v758_v31  ;;  %v767_v39 = vcombine.high %v716_v30, %v744_v32  ;;  %v3379_v29 = vld [vmem:[#allocation5 + $0x4f0] sm:$0xff]   ;;  %v3382_v32 = vld [vmem:[#allocation5 + $0x468] sm:$0xff]  }
  0x68   :  { %2972 = vmatprep.subr.bf16.mxu1 %v3295_v40  ;;  %v3342_v40 = vld [vmem:[#allocation5 + $0x370] sm:$0xff]  }
  0x69   :  { %v3380_v30 = vld [vmem:[#allocation5 + $0x430] sm:$0xff]  }
  0x6a   :  { %2951 = vmatpush3.bf16.msra.mxu0 %v3296_v41  ;;  %v3343_v41 = vld [vmem:[#allocation5 + $0x3f0] sm:$0xff]  }
  0x6b   :  { %2973 = vmatpush3.bf16.msra.mxu1 %v3297_v42  ;;  %2980 = vmatprep.subr.bf16.mxu0 %v3298_v45  ;;  %v3344_v42 = vld [vmem:[#allocation5 + $0x330] sm:$0xff]   ;;  %v3347_v45 = vld [vmem:[#allocation5 + $0x3e8] sm:$0xff]  }
  0x6c   :  { %3002 = vmatprep.subr.bf16.mxu1 %v3299_v46  ;;  %v3348_v46 = vld [vmem:[#allocation5 + $0x328] sm:$0xff]   ;;  %v3381_v31 = vld [vmem:[#allocation5 + $0x4b0] sm:$0xff]  }
  0x6d   :  { %2201 = vmatmul.mubr.bf16.vlgmr.msra.gmra.mxu0 %v632_v48  ;;  %v3350_v48 = vld [vmem:[#allocation5 + $0x360] sm:$0xff]  }
  0x6e   :  { %2242 = vmatmul.mubr.bf16.vlgmr.msra.gmra.mxu1 %v633_v49  ;;  %2981 = vmatpush3.bf16.msra.mxu0 %v3300_v47  ;;  %v3349_v47 = vld [vmem:[#allocation5 + $0x3a8] sm:$0xff]   ;;  %v3351_v49 = vld [vmem:[#allocation5 + $0x3e0] sm:$0xff]  }
  0x6f   :  { %3003 = vmatpush3.bf16.msra.mxu1 %v3301_v50  ;;  %2982 = vmatprep.subr.bf16.mxu0 %v3302_v51  ;;  %v3352_v50 = vld [vmem:[#allocation5 + $0x320] sm:$0xff]  }
  0x70   :  { %3004 = vmatprep.subr.bf16.mxu1 %v3303_v52  ;;  %2282 = vmatprep.mubr.bf16.mxu0 %v770_v35  ;;  %v3353_v51 = vld [vmem:[#allocation5 + $0x3a0] sm:$0xff]   ;;  %v3354_v52 = vld [vmem:[#allocation5 + $0x358] sm:$0xff]   ;;  %v3385_v35 = vld [vmem:[#allocation5 + $0x4a8] sm:$0xff]  }
  0x71   :  { %2323 = vmatprep.mubr.bf16.mxu1 %v771_v36  ;;  %v3386_v36 = vld [vmem:[#allocation5 + $0x460] sm:$0xff]  }
  0x72   :  { %2983 = vmatpush3.bf16.msra.mxu0 %v3304_v53  ;;  %v3355_v53 = vld [vmem:[#allocation5 + $0x3d8] sm:$0xff]  }
  0x73   :  { %3005 = vmatpush3.bf16.msra.mxu1 %v3305_v54  ;;  %2984 = vmatprep.subr.bf16.mxu0 %v3306_v55  ;;  %v3356_v54 = vld [vmem:[#allocation5 + $0x318] sm:$0xff]  }
  0x74   :  { %3006 = vmatprep.subr.bf16.mxu1 %v3307_v56  ;;  %v3357_v55 = vld [vmem:[#allocation5 + $0x398] sm:$0xff]   ;;  %v3358_v56 = vld [vmem:[#allocation5 + $0x350] sm:$0xff]  }
  0x76   :  { %2985 = vmatpush3.bf16.msra.mxu0 %v3308_v57  ;;  %v3359_v57 = vld [vmem:[#allocation5 + $0x3d0] sm:$0xff]  }
  0x77   :  { %3007 = vmatpush3.bf16.msra.mxu1 %v3309_v58  ;;  %2986 = vmatprep.subr.bf16.mxu0 %v3310_v59  ;;  %v3360_v58 = vld [vmem:[#allocation5 + $0x310] sm:$0xff]  }
  0x78   :  { %3008 = vmatprep.subr.bf16.mxu1 %v3311_v60  ;;  %v3361_v59 = vld [vmem:[#allocation5 + $0x390] sm:$0xff]   ;;  %v3362_v60 = vld [vmem:[#allocation5 + $0x348] sm:$0xff]  }
  0x7a   :  { %2987 = vmatpush3.bf16.msra.mxu0 %v3312_v61  ;;  %v3363_v61 = vld [vmem:[#allocation5 + $0x3c8] sm:$0xff]  }
  0x7b   :  { %3009 = vmatpush3.bf16.msra.mxu1 %v3313_v62  ;;  %2988 = vmatprep.subr.bf16.mxu0 %v3314_v63  ;;  %v3364_v62 = vld [vmem:[#allocation5 + $0x308] sm:$0xff]  }
  0x7c   :  { %3010 = vmatprep.subr.bf16.mxu1 %v3315_v0  ;;  %v3365_v63 = vld [vmem:[#allocation5 + $0x388] sm:$0xff]   ;;  %v3366_v0 = vld [vmem:[#allocation5 + $0x340] sm:$0xff]  }
  0x7e   :  { %2989 = vmatpush3.bf16.msra.mxu0 %v3316_v1  ;;  %v3367_v1 = vld [vmem:[#allocation5 + $0x3c0] sm:$0xff]  }
  0x7f   :  { %3011 = vmatpush3.bf16.msra.mxu1 %v3317_v2  ;;  %2990 = vmatprep.subr.bf16.mxu0 %v3318_v3  ;;  %v3370_v2 = vld [vmem:[#allocation2 + $0xc] ss:$24 sps:$4 sm:$0xff]   ;;  %v3371_v3 = vld [vmem:[#allocation2 + $0x3c] ss:$24 sps:$4 sm:$0xff]  }
  0x80   :  { %3012 = vmatprep.subr.bf16.mxu1 %v3319_v4  ;;  %v3372_v4 = vld [vmem:[#allocation2 + $0x6c] ss:$24 sps:$4 sm:$0xff]  }
  0x82   :  { %2991 = vmatpush3.bf16.msra.mxu0 %v3320_v5  ;;  %v3373_v5 = vld [vmem:[#allocation2 + $0x9c] ss:$24 sps:$4 sm:$0xff]  }
  0x83   :  { %3013 = vmatpush3.bf16.msra.mxu1 %v3321_v6  ;;  %2992 = vmatprep.subr.bf16.mxu0 %v3322_v7  ;;  %v659_v6 = vrot.slane %v3370_v2, %v3588_v37  ;;  %v673_v7 = vrot.slane %v3371_v3, %v3588_v37  ;;  %v3415_v2 = vld [vmem:[#allocation5 + $0x5f8] sm:$0xff]  }
  0x84   :  { %3014 = vmatprep.subr.bf16.mxu1 %v3323_v8  ;;  %v3368_v8 = vld [vmem:[#allocation5 + $0x300] sm:$0xff]  }
  0x86   :  { %2993 = vmatpush3.bf16.msra.mxu0 %v3324_v9  ;;  %v687_v9 = vrot.slane %v3372_v4, %v3588_v37 }
  0x87   :  { %3015 = vmatpush3.bf16.msra.mxu1 %v3325_v10  ;;  %2994 = vmatprep.subr.bf16.mxu0 %v3326_v11  ;;  %v701_v10 = vrot.slane %v3373_v5, %v3588_v37  ;;  %v3369_v11 = vld [vmem:[#allocation5 + $0x380] sm:$0xff]  }
  0x88   :  { %3016 = vmatprep.subr.bf16.mxu1 %v3327_v12  ;;  %v705_v12 = vcombine.high %v659_v6, %v673_v7 }
  0x89   :  { %v708_v15 = vcombine.low %v687_v9, %v701_v10 }
  0x8a   :  { %2995 = vmatpush3.bf16.msra.mxu0 %v3328_v13  ;;  %v704_v13 = vcombine.low %v659_v6, %v673_v7  ;;  %v737_v17 = vrot.slane %v705_v12, %v3588_v37  ;;  %v3417_v12 = vld [vmem:[#allocation5 + $0x5b8] sm:$0xff]  }
  0x8b   :  { %3017 = vmatpush3.bf16.msra.mxu1 %v3329_v14  ;;  %3024 = vmatprep.subr.bf16.mxu0 %v3338_v22  ;;  %v709_v14 = vcombine.high %v687_v9, %v701_v10  ;;  %v751_v21 = vrot.slane %v708_v15, %v3588_v37  ;;  %v3376_v22 = vld [vmem:[#allocation5 + $0x438] sm:$0xff]  }
  0x8c   :  { %3046 = vmatprep.subr.bf16.mxu1 %v3339_v24  ;;  %v723_v18 = vrot.slane %v704_v13, %v3588_v37 }
  0x8d   :  { %2283 = vmatmul.mubr.bf16.vlgmr.msra.gmra.mxu0 %v766_v38  ;;  %v765_v20 = vrot.slane %v709_v14, %v3588_v37  ;;  %v3387_v38 = vld [vmem:[#allocation5 + $0x4e0] sm:$0xff]  }
  0x8e   :  { %2324 = vmatmul.mubr.bf16.vlgmr.msra.gmra.mxu1 %v767_v39  ;;  %3025 = vmatpush3.bf16.msra.mxu0 %v3340_v33  ;;  %v768_v26 = vcombine.low %v723_v18, %v751_v21  ;;  %v769_v27 = vcombine.high %v723_v18, %v751_v21  ;;  %v3383_v33 = vld [vmem:[#allocation5 + $0x4e8] sm:$0xff]   ;;  %v3388_v39 = vld [vmem:[#allocation5 + $0x420] sm:$0xff]   ;;  %v3419_v18 = vld [vmem:[#allocation5 + $0x5f0] sm:$0xff]  }
  0x8f   :  { %3047 = vmatpush3.bf16.msra.mxu1 %v3341_v34  ;;  %3026 = vmatprep.subr.bf16.mxu0 %v3342_v40  ;;  %v772_v24 = vcombine.low %v737_v17, %v765_v20  ;;  %v773_v25 = vcombine.high %v737_v17, %v765_v20  ;;  %v3384_v34 = vld [vmem:[#allocation5 + $0x428] sm:$0xff]   ;;  %v3389_v40 = vld [vmem:[#allocation5 + $0x4a0] sm:$0xff]   ;;  %v3418_v17 = vld [vmem:[#allocation5 + $0x570] sm:$0xff]  }
  0x90   :  { %3048 = vmatprep.subr.bf16.mxu1 %v3343_v41  ;;  %v3390_v41 = vld [vmem:[#allocation5 + $0x458] sm:$0xff]   ;;  %v3421_v20 = vld [vmem:[#allocation5 + $0x5b0] sm:$0xff]   ;;  %v3422_v21 = vld [vmem:[#allocation5 + $0x568] sm:$0xff]  }
  0x91   :  { %2364 = vmatprep.mubr.bf16.mxu0 %v772_v24  ;;  %2405 = vmatprep.mubr.bf16.mxu1 %v773_v25  ;;  %v3425_v24 = vld [vmem:[#allocation5 + $0x5a8] sm:$0xff]   ;;  %v3426_v25 = vld [vmem:[#allocation5 + $0x560] sm:$0xff]  }
  0x92   :  { %3027 = vmatpush3.bf16.msra.mxu0 %v3344_v42  ;;  %v3391_v42 = vld [vmem:[#allocation5 + $0x4d8] sm:$0xff]  }
  0x93   :  { %3049 = vmatpush3.bf16.msra.mxu1 %v3345_v43  ;;  %3028 = vmatprep.subr.bf16.mxu0 %v3346_v44  ;;  %v3392_v43 = vld [vmem:[#allocation5 + $0x418] sm:$0xff]  }
  0x94   :  { %3050 = vmatprep.subr.bf16.mxu1 %v3347_v45  ;;  %v3393_v44 = vld [vmem:[#allocation5 + $0x498] sm:$0xff]   ;;  %v3394_v45 = vld [vmem:[#allocation5 + $0x450] sm:$0xff]  }
  0x96   :  { %3029 = vmatpush3.bf16.msra.mxu0 %v3348_v46  ;;  %v3395_v46 = vld [vmem:[#allocation5 + $0x4d0] sm:$0xff]  }
  0x97   :  { %3051 = vmatpush3.bf16.msra.mxu1 %v3349_v47  ;;  %3030 = vmatprep.subr.bf16.mxu0 %v3350_v48  ;;  %v3396_v47 = vld [vmem:[#allocation5 + $0x410] sm:$0xff]  }
  0x98   :  { %3052 = vmatprep.subr.bf16.mxu1 %v3351_v49  ;;  %v3397_v48 = vld [vmem:[#allocation5 + $0x490] sm:$0xff]   ;;  %v3398_v49 = vld [vmem:[#allocation5 + $0x448] sm:$0xff]  }
  0x9a   :  { %3031 = vmatpush3.bf16.msra.mxu0 %v3352_v50  ;;  %v3399_v50 = vld [vmem:[#allocation5 + $0x4c8] sm:$0xff]  }
  0x9b   :  { %3053 = vmatpush3.bf16.msra.mxu1 %v3353_v51  ;;  %3032 = vmatprep.subr.bf16.mxu0 %v3354_v52  ;;  %v3400_v51 = vld [vmem:[#allocation5 + $0x408] sm:$0xff]  }
  0x9c   :  { %3054 = vmatprep.subr.bf16.mxu1 %v3355_v53  ;;  %v3401_v52 = vld [vmem:[#allocation5 + $0x488] sm:$0xff]   ;;  %v3402_v53 = vld [vmem:[#allocation5 + $0x440] sm:$0xff]  }
  0x9e   :  { %3033 = vmatpush3.bf16.msra.mxu0 %v3356_v54  ;;  %v3403_v54 = vld [vmem:[#allocation5 + $0x4c0] sm:$0xff]  }
  0x9f   :  { %3055 = vmatpush3.bf16.msra.mxu1 %v3357_v55  ;;  %3034 = vmatprep.subr.bf16.mxu0 %v3358_v56  ;;  %v3404_v55 = vld [vmem:[#allocation5 + $0x400] sm:$0xff]  }
  0xa0   :  { %3056 = vmatprep.subr.bf16.mxu1 %v3359_v57  ;;  %v3405_v56 = vld [vmem:[#allocation5 + $0x480] sm:$0xff]   ;;  %v3406_v57 = vld [vmem:[#allocation2 + $0x10] ss:$24 sps:$4 sm:$0xff]  }
  0xa2   :  { %3035 = vmatpush3.bf16.msra.mxu0 %v3360_v58  ;;  %v3408_v58 = vld [vmem:[#allocation2 + $0x40] ss:$24 sps:$4 sm:$0xff]  }
  0xa3   :  { %3057 = vmatpush3.bf16.msra.mxu1 %v3361_v59  ;;  %3036 = vmatprep.subr.bf16.mxu0 %v3362_v60  ;;  %v3410_v59 = vld [vmem:[#allocation2 + $0x70] ss:$24 sps:$4 sm:$0xff]   ;;  %v3412_v60 = vld [vmem:[#allocation2 + $0xa0] ss:$24 sps:$4 sm:$0xff]  }
  0xa4   :  { %3058 = vmatprep.subr.bf16.mxu1 %v3363_v61  ;;  %v788_v61 = vrot.slane %v3406_v57, %v3588_v37 }
  0xa6   :  { %3037 = vmatpush3.bf16.msra.mxu0 %v3364_v62  ;;  %v802_v62 = vrot.slane %v3408_v58, %v3588_v37 }
  0xa7   :  { %3059 = vmatpush3.bf16.msra.mxu1 %v3365_v63  ;;  %3038 = vmatprep.subr.bf16.mxu0 %v3366_v0  ;;  %v3414_v63 = vld [vmem:[#allocation5 + $0x578] sm:$0xff]   ;;  %v816_v0 = vrot.slane %v3410_v59, %v3588_v37 }
  0xa8   :  { %3060 = vmatprep.subr.bf16.mxu1 %v3367_v1  ;;  %v830_v1 = vrot.slane %v3412_v60, %v3588_v37  ;;  %v839_v3 = vcombine.high %v788_v61, %v802_v62  ;;  %v838_v4 = vcombine.low %v788_v61, %v802_v62 }
  0xaa   :  { %3039 = vmatpush3.bf16.msra.mxu0 %v3368_v8  ;;  %v843_v5 = vcombine.high %v816_v0, %v830_v1  ;;  %v842_v6 = vcombine.low %v816_v0, %v830_v1  ;;  %v866_v7 = vrot.slane %v839_v3, %v3588_v37  ;;  %v852_v8 = vrot.slane %v838_v4, %v3588_v37  ;;  %v2594_v3 = vld [vmem:[#allocation7 + $0x70] sm:$0xff]  ;;  %v2593_v4 = vld [vmem:[#allocation7 + $0x68] sm:$0xff] }
  0xab   :  { %3061 = vmatpush3.bf16.msra.mxu1 %v3369_v11  ;;  %3068 = vmatprep.subr.bf16.mxu0 %v3374_v16  ;;  %v3416_v11 = vld [vmem:[#allocation5 + $0x538] sm:$0xff]  }
  0xac   :  { %3090 = vmatprep.subr.bf16.mxu1 %v3375_v19  ;;  %v894_v9 = vrot.slane %v843_v5, %v3588_v37  ;;  %v880_v10 = vrot.slane %v842_v6, %v3588_v37  ;;  %v3420_v19 = vld [vmem:[#allocation5 + $0x530] sm:$0xff]   ;;  %v2592_v5 = vld [vmem:[#allocation7 + $0x60] sm:$0xff]  ;;  %v2591_v6 = vld [vmem:[#allocation7 + $0x58] sm:$0xff] }
  0xad   :  { %2365 = vmatmul.mubr.bf16.vlgmr.msra.gmra.mxu0 %v768_v26  ;;  %v3427_v26 = vld [vmem:[#allocation5 + $0x5e0] sm:$0xff]  }
  0xae   :  { %2406 = vmatmul.mubr.bf16.vlgmr.msra.gmra.mxu1 %v769_v27  ;;  %3069 = vmatpush3.bf16.msra.mxu0 %v3376_v22  ;;  %v906_v13 = vcombine.low %v866_v7, %v894_v9  ;;  %v907_v14 = vcombine.high %v866_v7, %v894_v9  ;;  %v902_v15 = vcombine.low %v852_v8, %v880_v10  ;;  %v3423_v22 = vld [vmem:[#allocation5 + $0x5e8] sm:$0xff]   ;;  %v3428_v27 = vld [vmem:[#allocation5 + $0x520] sm:$0xff]   ;;  %v2587_v9 = vld [vmem:[#allocation7 + $0x38] sm:$0xff] }
  0xaf   :  { %3091 = vmatpush3.bf16.msra.mxu1 %v3377_v23  ;;  %3070 = vmatprep.subr.bf16.mxu0 %v3378_v28  ;;  %v903_v16 = vcombine.high %v852_v8, %v880_v10  ;;  %v3424_v23 = vld [vmem:[#allocation5 + $0x528] sm:$0xff]   ;;  %v3429_v28 = vld [vmem:[#allocation5 + $0x5a0] sm:$0xff]   ;;  %v2586_v10 = vld [vmem:[#allocation7 + $0x30] sm:$0xff] }
  0xb0   :  { %3092 = vmatprep.subr.bf16.mxu1 %v3379_v29  ;;  %2446 = vmatprep.mubr.bf16.mxu0 %v906_v13  ;;  %v3430_v29 = vld [vmem:[#allocation5 + $0x558] sm:$0xff]   ;;  %v2589_v7 = vld [vmem:[#allocation7 + $0x48] sm:$0xff]  ;;  %v2588_v8 = vld [vmem:[#allocation7 + $0x40] sm:$0xff] }
  0xb1   :  { %2487 = vmatprep.mubr.bf16.mxu1 %v907_v14  ;;  %v2583_v13 = vld [vmem:[#allocation7 + $0x18] sm:$0xff]  ;;  %v2582_v14 = vld [vmem:[#allocation7 + $0x10] sm:$0xff] }
  0xb2   :  { %3071 = vmatpush3.bf16.msra.mxu0 %v3380_v30  ;;  %v3431_v30 = vld [vmem:[#allocation5 + $0x5d8] sm:$0xff]  }
  0xb3   :  { %3093 = vmatpush3.bf16.msra.mxu1 %v3381_v31  ;;  %3072 = vmatprep.subr.bf16.mxu0 %v3382_v32  ;;  %v3432_v31 = vld [vmem:[#allocation5 + $0x518] sm:$0xff]  }
  0xb4   :  { %3094 = vmatprep.subr.bf16.mxu1 %v3383_v33  ;;  %v3433_v32 = vld [vmem:[#allocation5 + $0x598] sm:$0xff]   ;;  %v3434_v33 = vld [vmem:[#allocation5 + $0x550] sm:$0xff]  }
  0xb6   :  { %3073 = vmatpush3.bf16.msra.mxu0 %v3384_v34  ;;  %v3435_v34 = vld [vmem:[#allocation5 + $0x5d0] sm:$0xff]  }
  0xb7   :  { %3095 = vmatpush3.bf16.msra.mxu1 %v3385_v35  ;;  %3074 = vmatprep.subr.bf16.mxu0 %v3386_v36  ;;  %v3436_v35 = vld [vmem:[#allocation5 + $0x510] sm:$0xff]  }
  0xb8   :  { %3096 = vmatprep.subr.bf16.mxu1 %v3387_v38  ;;  %v3437_v36 = vld [vmem:[#allocation5 + $0x590] sm:$0xff]   ;;  %v3438_v38 = vld [vmem:[#allocation5 + $0x548] sm:$0xff]  }
  0xba   :  { %3075 = vmatpush3.bf16.msra.mxu0 %v3388_v39  ;;  %v3439_v39 = vld [vmem:[#allocation5 + $0x5c8] sm:$0xff]  }
  0xbb   :  { %3097 = vmatpush3.bf16.msra.mxu1 %v3389_v40  ;;  %3076 = vmatprep.subr.bf16.mxu0 %v3390_v41  ;;  %v3440_v40 = vld [vmem:[#allocation5 + $0x508] sm:$0xff]  }
  0xbc   :  { %3098 = vmatprep.subr.bf16.mxu1 %v3391_v42  ;;  %v3441_v41 = vld [vmem:[#allocation5 + $0x588] sm:$0xff]   ;;  %v3442_v42 = vld [vmem:[#allocation5 + $0x540] sm:$0xff]  }
  0xbe   :  { %3077 = vmatpush3.bf16.msra.mxu0 %v3392_v43  ;;  %v3443_v43 = vld [vmem:[#allocation5 + $0x5c0] sm:$0xff]  }
  0xbf   :  { %3099 = vmatpush3.bf16.msra.mxu1 %v3393_v44  ;;  %3078 = vmatprep.subr.bf16.mxu0 %v3394_v45  ;;  %v3446_v44 = vld [vmem:[#allocation2 + $0x14] ss:$24 sps:$4 sm:$0xff]   ;;  %v3447_v45 = vld [vmem:[#allocation2 + $0x44] ss:$24 sps:$4 sm:$0xff]  }
  0xc0   :  { %3100 = vmatprep.subr.bf16.mxu1 %v3395_v46  ;;  %v3448_v46 = vld [vmem:[#allocation2 + $0x74] ss:$24 sps:$4 sm:$0xff]  }
  0xc2   :  { %3079 = vmatpush3.bf16.msra.mxu0 %v3396_v47  ;;  %v3449_v47 = vld [vmem:[#allocation2 + $0xa4] ss:$24 sps:$4 sm:$0xff]  }
  0xc3   :  { %3101 = vmatpush3.bf16.msra.mxu1 %v3397_v48  ;;  %3080 = vmatprep.subr.bf16.mxu0 %v3398_v49  ;;  %v795_v48 = vrot.slane %v3446_v44, %v3588_v37  ;;  %v809_v49 = vrot.slane %v3447_v45, %v3588_v37  ;;  %v2698_v44 = vld [vmem:[%s3665_s2] ss:$0 sm:$0xff] }
  0xc4   :  { %3102 = vmatprep.subr.bf16.mxu1 %v3399_v50  ;;  %v823_v50 = vrot.slane %v3448_v46, %v3588_v37 }
  0xc6   :  { %3081 = vmatpush3.bf16.msra.mxu0 %v3400_v51  ;;  %v837_v51 = vrot.slane %v3449_v47, %v3588_v37 }
  0xc7   :  { %3103 = vmatpush3.bf16.msra.mxu1 %v3401_v52  ;;  %3082 = vmatprep.subr.bf16.mxu0 %v3402_v53  ;;  %v3444_v52 = vld [vmem:[#allocation5 + $0x500] sm:$0xff]  }
  0xc8   :  { %3104 = vmatprep.subr.bf16.mxu1 %v3403_v54  ;;  %v3445_v53 = vld [vmem:[#allocation5 + $0x580] sm:$0xff]   ;;  %v841_v54 = vcombine.high %v795_v48, %v809_v49  ;;  %v844_v57 = vcombine.low %v823_v50, %v837_v51 }
  0xca   :  { %3083 = vmatpush3.bf16.msra.mxu0 %v3404_v55  ;;  %v845_v55 = vcombine.high %v823_v50, %v837_v51  ;;  %v873_v58 = vrot.slane %v841_v54, %v3588_v37  ;;  %v887_v61 = vrot.slane %v844_v57, %v3588_v37 }
  0xcb   :  { %3105 = vmatpush3.bf16.msra.mxu1 %v3405_v56  ;;  %3112 = vmatprep.subr.bf16.mxu0 %v3414_v63  ;;  %v840_v56 = vcombine.low %v795_v48, %v809_v49 }
  0xcc   :  { %3134 = vmatprep.subr.bf16.mxu1 %v3415_v2  ;;  %v901_v59 = vrot.slane %v845_v55, %v3588_v37  ;;  %v2595_v2 = vld [vmem:[#allocation7 + $0x78] sm:$0xff] }
  0xcd   :  { %2447 = vmatmul.mubr.bf16.vlgmr.msra.gmra.mxu0 %v902_v15  ;;  %v859_v60 = vrot.slane %v840_v56, %v3588_v37  ;;  %v2590_v37 = vld [vmem:[#allocation7 + $0x50] sm:$0xff]  ;;  %v2581_v15 = vld [vmem:[#allocation7 + $0x8] sm:$0xff] }
  0xce   :  { %2488 = vmatmul.mubr.bf16.vlgmr.msra.gmra.mxu1 %v903_v16  ;;  %3113 = vmatpush3.bf16.msra.mxu0 %v3416_v11  ;;  %v908_v62 = vcombine.low %v873_v58, %v901_v59  ;;  %v909_v63 = vcombine.high %v873_v58, %v901_v59  ;;  %v2585_v11 = vld [vmem:[#allocation7 + $0x28] sm:$0xff]  ;;  %v2580_v16 = vld [vmem:[#allocation7] sm:$0xff] }
  0xcf   :  { %3135 = vmatpush3.bf16.msra.mxu1 %v3417_v12  ;;  %3114 = vmatprep.subr.bf16.mxu0 %v3418_v17  ;;  %v904_v0 = vcombine.low %v859_v60, %v887_v61  ;;  %v905_v1 = vcombine.high %v859_v60, %v887_v61  ;;  %v2584_v12 = vld [vmem:[#allocation7 + $0x20] sm:$0xff] }
  0xd0   :  { %3136 = vmatprep.subr.bf16.mxu1 %v3419_v18  ;;  %2528 = vmatprep.mubr.bf16.mxu0 %v908_v62 }
  0xd1   :  { %2569 = vmatprep.mubr.bf16.mxu1 %v909_v63 }
  0xd2   :  { %3115 = vmatpush3.bf16.msra.mxu0 %v3420_v19 }
  0xd3   :  { %3137 = vmatpush3.bf16.msra.mxu1 %v3421_v20  ;;  %3116 = vmatprep.subr.bf16.mxu0 %v3422_v21 }
  0xd4   :  { %3138 = vmatprep.subr.bf16.mxu1 %v3423_v22 }
  0xd6   :  { %3117 = vmatpush3.bf16.msra.mxu0 %v3424_v23 }
  0xd7   :  { %3139 = vmatpush3.bf16.msra.mxu1 %v3425_v24  ;;  %3118 = vmatprep.subr.bf16.mxu0 %v3426_v25 }
  0xd8   :  { %3140 = vmatprep.subr.bf16.mxu1 %v3427_v26 }
  0xda   :  { %3119 = vmatpush3.bf16.msra.mxu0 %v3428_v27 }
  0xdb   :  { %3141 = vmatpush3.bf16.msra.mxu1 %v3429_v28  ;;  %3120 = vmatprep.subr.bf16.mxu0 %v3430_v29 }
  0xdc   :  { %3142 = vmatprep.subr.bf16.mxu1 %v3431_v30 }
  0xde   :  { %3121 = vmatpush3.bf16.msra.mxu0 %v3432_v31 }
  0xdf   :  { %3143 = vmatpush3.bf16.msra.mxu1 %v3433_v32  ;;  %3122 = vmatprep.subr.bf16.mxu0 %v3434_v33 }
  0xe0   :  { %3144 = vmatprep.subr.bf16.mxu1 %v3435_v34 }
  0xe2   :  { %3123 = vmatpush3.bf16.msra.mxu0 %v3436_v35 }
  0xe3   :  { %3145 = vmatpush3.bf16.msra.mxu1 %v3437_v36  ;;  %3124 = vmatprep.subr.bf16.mxu0 %v3438_v38 }
  0xe4   :  { %3146 = vmatprep.subr.bf16.mxu1 %v3439_v39 }
  0xe6   :  { %3125 = vmatpush3.bf16.msra.mxu0 %v3440_v40 }
  0xe7   :  { %3147 = vmatpush3.bf16.msra.mxu1 %v3441_v41  ;;  %3126 = vmatprep.subr.bf16.mxu0 %v3442_v42 }
  0xe8   :  { %3148 = vmatprep.subr.bf16.mxu1 %v3443_v43 }
  0xea   :  { %3127 = vmatpush3.bf16.msra.mxu0 %v3444_v52 }
  0xeb   :  { %3149 = vmatpush3.bf16.msra.mxu1 %v3445_v53  ;;  %3174 = vmatprep.subr.mxu0 %v2595_v2 }
  0xed   :  { %2529 = vmatmul.mubr.bf16.vlgmr.msra.gmra.mxu0 %v904_v0 }
  0xee   :  { %2570 = vmatmul.mubr.bf16.vlgmr.msra.gmra.mxu1 %v905_v1  ;;  %3175 = vmatpush3.msra.mxu0 %v2595_v2 }
  0xef   :  { %3176 = vmatprep.subr.mxu0 %v2594_v3 }
  0xf0   :  { %3177 = vmatpush3.msra.mxu0 %v2594_v3 }
  0xf1   :  { %3178 = vmatprep.subr.mxu0 %v2593_v4 }
  0xf2   :  { %3179 = vmatpush3.msra.mxu0 %v2593_v4 }
  0xf3   :  { %3180 = vmatprep.subr.mxu0 %v2592_v5 }
  0xf4   :  { %3181 = vmatpush3.msra.mxu0 %v2592_v5 }
  0xf5   :  { %3182 = vmatprep.subr.mxu0 %v2591_v6 }
  0xf6   :  { %3183 = vmatpush3.msra.mxu0 %v2591_v6 }
  0xf7   :  { %3184 = vmatprep.subr.mxu0 %v2590_v37 }
  0xf8   :  { %3185 = vmatpush3.msra.mxu0 %v2590_v37 }
  0xf9   :  { %3186 = vmatprep.subr.mxu0 %v2589_v7 }
  0xfa   :  { %3187 = vmatpush3.msra.mxu0 %v2589_v7 }
  0xfb   :  { %3188 = vmatprep.subr.mxu0 %v2588_v8 }
  0xfc   :  { %3189 = vmatpush3.msra.mxu0 %v2588_v8 }
  0xfd   :  { %3190 = vmatprep.subr.mxu0 %v2587_v9 }
  0xfe   :  { %3191 = vmatpush3.msra.mxu0 %v2587_v9 }
  0xff   :  { %3192 = vmatprep.subr.mxu0 %v2586_v10 }
 0x100   :  { %3193 = vmatpush3.msra.mxu0 %v2586_v10 }
 0x101   :  { %3194 = vmatprep.subr.mxu0 %v2585_v11 }
 0x102   :  { %3195 = vmatpush3.msra.mxu0 %v2585_v11 }
 0x103   :  { %3196 = vmatprep.subr.mxu0 %v2584_v12 }
 0x104   :  { %3197 = vmatpush3.msra.mxu0 %v2584_v12 }
 0x105   :  { %3198 = vmatprep.subr.mxu0 %v2583_v13 }
 0x106   :  { %3199 = vmatpush3.msra.mxu0 %v2583_v13 }
 0x107   :  { %3200 = vmatprep.subr.mxu0 %v2582_v14 }
 0x108   :  { %3201 = vmatpush3.msra.mxu0 %v2582_v14 }
 0x109   :  { %3202 = vmatprep.subr.mxu0 %v2581_v15 }
 0x10a   :  { %3203 = vmatpush3.msra.mxu0 %v2581_v15 }
 0x10b   :  { %3204 = vmatprep.subr.mxu0 %v2580_v16 }
 0x10c   :  { %3205 = vmatpush3.msra.mxu0 %v2580_v16 }
 0x10d   :  { %v2908_v17 = vpop.f32.mrf.mxu0 }
 0x10e   :  { %v2930_v18 = vpop.f32.mrf.mxu1 }
 0x10f   :  { %v2909_v19 = vpop.f32.mrf.mxu0 }
 0x110   :  { %v2931_v20 = vpop.f32.mrf.mxu1  ;;  %v2910_v43 = vadd.f32 %v2909_v19, %v2908_v17 }
 0x111   :  { %v2911_v21 = vpop.f32.mrf.mxu0  ;;  %v2932_v48 = vadd.f32 %v2931_v20, %v2930_v18 }
 0x112   :  { %v2933_v22 = vpop.f32.mrf.mxu1  ;;  %v2121_v47 = vadd.f32 %v2910_v43, %v2698_v44 }
 0x113   :  { %v2912_v23 = vpop.f32.mrf.mxu0 }
 0x114   :  { %v2934_v24 = vpop.f32.mrf.mxu1  ;;  %v2913_v49 = vadd.f32 %v2912_v23, %v2911_v21  ;;  %v2162_v53 = vadd.f32 %v2932_v48, %v2121_v47 }
 0x115   :  { %v2935_v56 = vadd.f32 %v2934_v24, %v2933_v22 }
 0x116   :  { %v2124_v54 = vadd.f32 %v2913_v49, %v2698_v44 }
 0x118   :  { %v2165_v61 = vadd.f32 %v2935_v56, %v2124_v54 }
 0x12d   :  { %v2952_v25 = vpop.f32.mrf.mxu0 }
 0x12e   :  { %v2974_v26 = vpop.f32.mrf.mxu1 }
 0x12f   :  { %v2953_v27 = vpop.f32.mrf.mxu0 }
 0x130   :  { %v2975_v28 = vpop.f32.mrf.mxu1  ;;  %v2954_v51 = vadd.f32 %v2953_v27, %v2952_v25 }
 0x131   :  { %v2955_v29 = vpop.f32.mrf.mxu0  ;;  %v2976_v58 = vadd.f32 %v2975_v28, %v2974_v26 }
 0x132   :  { %v2977_v30 = vpop.f32.mrf.mxu1  ;;  %v2203_v57 = vadd.f32 %v2954_v51, %v2162_v53  ;;  %v2891_v53 = vld [vmem:[%s3667_s4] ss:$0 sm:$0xff] }
 0x133   :  { %v2956_v31 = vpop.f32.mrf.mxu0 }
 0x134   :  { %v2978_v32 = vpop.f32.mrf.mxu1  ;;  %v2957_v59 = vadd.f32 %v2956_v31, %v2955_v29  ;;  %v2244_v1 = vadd.f32 %v2976_v58, %v2203_v57 }
 0x135   :  { %v2979_v4 = vadd.f32 %v2978_v32, %v2977_v30 }
 0x136   :  { %v2206_v2 = vadd.f32 %v2957_v59, %v2165_v61 }
 0x138   :  { %v2247_v8 = vadd.f32 %v2979_v4, %v2206_v2 }
 0x14d   :  { %v2996_v33 = vpop.f32.mrf.mxu0 }
 0x14e   :  { %v3018_v34 = vpop.f32.mrf.mxu1 }
 0x14f   :  { %v2997_v35 = vpop.f32.mrf.mxu0 }
 0x150   :  { %v3019_v36 = vpop.f32.mrf.mxu1  ;;  %v2998_v62 = vadd.f32 %v2997_v35, %v2996_v33 }
 0x151   :  { %v2999_v38 = vpop.f32.mrf.mxu0  ;;  %v3020_v6 = vadd.f32 %v3019_v36, %v3018_v34 }
 0x152   :  { %v3021_v39 = vpop.f32.mrf.mxu1  ;;  %v2285_v5 = vadd.f32 %v2998_v62, %v2244_v1 }
 0x153   :  { %v3000_v40 = vpop.f32.mrf.mxu0 }
 0x154   :  { %v3022_v41 = vpop.f32.mrf.mxu1  ;;  %v3001_v37 = vadd.f32 %v3000_v40, %v2999_v38  ;;  %v2326_v11 = vadd.f32 %v3020_v6, %v2285_v5 }
 0x155   :  { %v3023_v14 = vadd.f32 %v3022_v41, %v3021_v39 }
 0x156   :  { %v2288_v12 = vadd.f32 %v3001_v37, %v2247_v8 }
 0x158   :  { %v2329_v19 = vadd.f32 %v3023_v14, %v2288_v12 }
 0x16d   :  { %v3040_v42 = vpop.f32.mrf.mxu0 }
 0x16e   :  { %v3062_v45 = vpop.f32.mrf.mxu1 }
 0x16f   :  { %v3041_v46 = vpop.f32.mrf.mxu0 }
 0x170   :  { %v3063_v50 = vpop.f32.mrf.mxu1  ;;  %v3042_v9 = vadd.f32 %v3041_v46, %v3040_v42 }
 0x171   :  { %v3043_v52 = vpop.f32.mrf.mxu0  ;;  %v3064_v16 = vadd.f32 %v3063_v50, %v3062_v45 }
 0x172   :  { %v3065_v55 = vpop.f32.mrf.mxu1  ;;  %v2367_v15 = vadd.f32 %v3042_v9, %v2326_v11 }
 0x173   :  { %v3044_v60 = vpop.f32.mrf.mxu0 }
 0x174   :  { %v3066_v63 = vpop.f32.mrf.mxu1  ;;  %v3045_v17 = vadd.f32 %v3044_v60, %v3043_v52  ;;  %v2408_v22 = vadd.f32 %v3064_v16, %v2367_v15 }
 0x175   :  { %v3067_v25 = vadd.f32 %v3066_v63, %v3065_v55 }
 0x176   :  { %v2370_v23 = vadd.f32 %v3045_v17, %v2329_v19 }
 0x178   :  { %v2411_v31 = vadd.f32 %v3067_v25, %v2370_v23 }
 0x18d   :  { %v3084_v0 = vpop.f32.mrf.mxu0 }
 0x18e   :  { %v3106_v3 = vpop.f32.mrf.mxu1 }
 0x18f   :  { %v3085_v7 = vpop.f32.mrf.mxu0 }
 0x190   :  { %v3107_v10 = vpop.f32.mrf.mxu1  ;;  %v3086_v20 = vadd.f32 %v3085_v7, %v3084_v0 }
 0x191   :  { %v3087_v13 = vpop.f32.mrf.mxu0  ;;  %v3108_v27 = vadd.f32 %v3107_v10, %v3106_v3 }
 0x192   :  { %v3109_v18 = vpop.f32.mrf.mxu1  ;;  %v2449_v26 = vadd.f32 %v3086_v20, %v2408_v22 }
 0x193   :  { %v3088_v21 = vpop.f32.mrf.mxu0 }
 0x194   :  { %v3110_v24 = vpop.f32.mrf.mxu1  ;;  %v3089_v28 = vadd.f32 %v3088_v21, %v3087_v13  ;;  %v2490_v34 = vadd.f32 %v3108_v27, %v2449_v26 }
 0x195   :  { %v3111_v40 = vadd.f32 %v3110_v24, %v3109_v18 }
 0x196   :  { %v2452_v35 = vadd.f32 %v3089_v28, %v2411_v31 }
 0x198   :  { %v2493_v45 = vadd.f32 %v3111_v40, %v2452_v35 }
 0x1ad   :  { %v3128_v29 = vpop.f32.mrf.mxu0 }
 0x1ae   :  { %v3150_v30 = vpop.f32.mrf.mxu1 }
 0x1af   :  { %v3129_v32 = vpop.f32.mrf.mxu0 }
 0x1b0   :  { %v3151_v33 = vpop.f32.mrf.mxu1  ;;  %v3130_v36 = vadd.f32 %v3129_v32, %v3128_v29 }
 0x1b1   :  { %v3131_v38 = vpop.f32.mrf.mxu0  ;;  %v3152_v42 = vadd.f32 %v3151_v33, %v3150_v30 }
 0x1b2   :  { %v3153_v39 = vpop.f32.mrf.mxu1  ;;  %v2531_v41 = vadd.f32 %v3130_v36, %v2490_v34 }
 0x1b3   :  { %v3132_v43 = vpop.f32.mrf.mxu0 }
 0x1b4   :  { %v3154_v44 = vpop.f32.mrf.mxu1  ;;  %v2572_v46 = vadd.f32 %v3152_v42, %v2531_v41  ;;  %v3133_v47 = vadd.f32 %v3132_v43, %v3131_v38 }
 0x1b5   :  { %v3155_v50 = vadd.f32 %v3154_v44, %v3153_v39 }
 0x1b6   :  { %v2578_v48 = vmax.f32 %v2572_v46, 0.0  ;;  %v2534_v49 = vadd.f32 %v3133_v47, %v2493_v45 }
 0x1b8   :  { %v2575_v51 = vadd.f32 %v3155_v50, %v2534_v49  ;;  %3206 = vmatprep.mubr.f32.mxu0 %v2578_v48 }
 0x1ba   :  { %v2579_v52 = vmax.f32 %v2575_v51, 0.0 }
 0x1bc   :  { %3207 = vmatmul.mubr.f32.vlgmr.msra.gmra.mxu0 %v2579_v52 }
 0x27c   :  { %v3208_v54 = vpop.f32.mrf.mxu0 }
 0x27d   :  { %v2675_v55 = vadd.f32 %v3208_v54, %v2891_v53 }
 0x27e   :  { %v2669_v56 = vpop.f32.mrf.mxu0 }
 0x27f   :  { %2679 = vst [vmem:[#allocation8 + $0x8] sm:$0xff] %v2675_v55  ;;  %v2670_v57 = vadd.f32 %v2891_v53, %v2669_v56 }
 0x281   :  { %2678 = vst [vmem:[#allocation8] sm:$0xff] %v2670_v57 }
 0x282   :  { %2684 = vsyncadd [#allocation4], 224  ;;  %s3546_s15 = smov [#allocation8]  }
 0x283   :  { %s2685_s16 = sshll.u32 %s3546_s15, 4  ;;  %s2686_s16 = int_to_ptr.vmem [resolvable:$true] %s2685_s16 }
 0x284   :  { %s3510_s17 = scalar_lea.vmem %s2686_s16, 32  ;;  %s3514_s18 = scalar_lea.vmem %s2686_s16, 256 }
 0x285   :  { %p3511_p1 = scmp.ne.s32.totalorder %s2686_s16, %s3510_s17  ;;  %p3515_p2 = scmp.lt.s32.totalorder %s2686_s16, %s2686_s16 }
 0x286   :  { %p3516_p3 = scmp.lt.s32.totalorder %s3514_s18, %s3510_s17 }
 0x288   :  { %p3517_p4 = por %p3516_p3, %p3515_p2 }
 0x28a   :  { %p3518_p5 = pnand %p3517_p4, %p3511_p1 }
 0x28c   :  { %3521 = shalt.err (!%p3518_p5)
}
 0x28d   :  { %s3547_s19 = smov 32   ;;  %s3548_s4 = smov 2  }
 0x28e   :  { %2691 = dma.vmem_to_hbm [thread:$0]  %s2686_s16, 32, %s3668_s5, [#allocation4], %s3547_s19, %s3547_s19, %s3548_s4  }
 0x28f   :  { %3534 = dma.done.wait [#allocation4], 256  }
 0x290   :  { %3535 = vsyncadd [#allocation4], 4294967040 }
 0x291   :  { %2695 = vsyncpa [#allocation3], 1 }
 0x292   :  { %2696 = vsyncpa [#allocation6], 1 }
 0x293   :  { %2697 = vsyncpa [#allocation4], 1 }

// kernel: tpu_custom_call.1
= control target key start
LH: loop header
LB: loop body
LE: loop exit
PB: predicated region body
PF: predicated region fallthrough
CT: control target
= control target key end

     0   :  { %10 = vsyncpa [#allocation3], 0  ;;  %s3663_s0 = inlined_call_operand.hbm [shape: bf16[2,3072], index: 0, kind: input, shape index: {}]   ;;  %s3664_s1 = inlined_call_operand.hbm [shape: bf16[3072,128], index: 1, kind: input, shape index: {}]   ;;  %s3665_s2 = inlined_call_operand.vmem [shape: f32[1,128], index: 2, kind: input, shape index: {}]   ;;  %s3666_s3 = inlined_call_operand.hbm [shape: f32[128,128], index: 3, kind: input, shape index: {}]   ;;  %s3667_s4 = inlined_call_operand.vmem [shape: f32[1,128], index: 4, kind: input, shape index: {}]   ;;  %s3668_s5 = inlined_call_operand.hbm [shape: f32[2,128], index: 5, kind: output, shape index: {}]  }
   0x1   :  { %11 = vsyncpa [#allocation6], 0 }
   0x2   :  { %12 = vsyncpa [#allocation4], 0 }
   0x3   :  { %17 = vsyncadd [#allocation3], 2688  ;;  %s3536_s18 = smov [#allocation5]  }
   0x4   :  { %s30_s19 = sshll.u32 %s3536_s18, 4  ;;  %s31_s19 = int_to_ptr.vmem [resolvable:$true] %s30_s19 }
   0x5   :  { %s3458_s20 = scalar_lea.vmem %s31_s19, 24576  ;;  %p3463_p1 = scmp.lt.s32.totalorder %s31_s19, %s31_s19 }
   0x6   :  { %p3459_p0 = scmp.ne.s32.totalorder %s31_s19, %s3458_s20  ;;  %p3464_p2 = scmp.lt.s32.totalorder %s3458_s20, %s3458_s20 }
   0x8   :  { %p3465_p3 = por %p3464_p2, %p3463_p1 }
   0xa   :  { %p3466_p4 = pnand %p3465_p3, %p3459_p0 }
   0xc   :  { %3469 = shalt.err (!%p3466_p4)
}
   0xd   :  { %s3537_s21 = smov 64   ;;  %s3538_s22 = smov 4  }
   0xe   :  { %36 = dma.hbm_to_vmem [thread:$0]  %s3664_s1, 24576, %s31_s19, [#allocation6], %s3537_s21, %s3537_s21, %s3538_s22  }
   0xf   :  { %s3539_s25 = smov [#allocation2]  }
  0x10   :  { %s18_s26 = sshll.u32 %s3539_s25, 4  ;;  %s19_s26 = int_to_ptr.vmem [resolvable:$true] %s18_s26 }
  0x11   :  { %s3478_s27 = scalar_lea.vmem %s19_s26, 384  ;;  %s3482_s28 = scalar_lea.vmem %s19_s26, 3072 }
  0x12   :  { %p3479_p5 = scmp.ne.s32.totalorder %s19_s26, %s3478_s27  ;;  %p3483_p6 = scmp.lt.s32.totalorder %s19_s26, %s19_s26 }
  0x13   :  { %p3484_p7 = scmp.lt.s32.totalorder %s3482_s28, %s3478_s27 }
  0x15   :  { %p3485_p8 = por %p3484_p7, %p3483_p6 }
  0x17   :  { %p3486_p9 = pnand %p3485_p8, %p3479_p5 }
  0x19   :  { %3489 = shalt.err (!%p3486_p9)
}
  0x1a   :  { %s3540_s29 = smov 384   ;;  %s3541_s30 = smov 24  }
  0x1b   :  { %24 = dma.hbm_to_vmem [thread:$0]  %s3663_s0, 384, %s19_s26, [#allocation3], %s3540_s29, %s3540_s29, %s3541_s30  }
  0x1c   :  { %s3542_s8 = smov [#allocation7]  }
  0x1d   :  { %s44_s9 = sshll.u32 %s3542_s8, 4  ;;  %s45_s9 = int_to_ptr.vmem [resolvable:$true] %s44_s9 }
  0x1e   :  { %s3498_s1 = scalar_lea.vmem %s45_s9, 2048  ;;  %p3503_p11 = scmp.lt.s32.totalorder %s45_s9, %s45_s9 }
  0x1f   :  { %p3499_p10 = scmp.ne.s32.totalorder %s45_s9, %s3498_s1  ;;  %p3504_p12 = scmp.lt.s32.totalorder %s3498_s1, %s3498_s1 }
  0x21   :  { %p3505_p13 = por %p3504_p12, %p3503_p11 }
  0x23   :  { %p3506_p0 = pnand %p3505_p13, %p3499_p10 }
  0x25   :  { %3509 = shalt.err (!%p3506_p0)
}
  0x26   :  { %s3543_s10 = smov 128   ;;  %s3544_s11 = smov 8  }
  0x27   :  { %50 = dma.hbm_to_vmem [thread:$0]  %s3666_s3, 2048, %s45_s9, [#allocation6], %s3543_s10, %s3543_s10, %s3544_s11  }
  0x28   :  { %3530 = dma.done.wait [#allocation3], 3072  }
  0x29   :  { %3531 = vsyncadd [#allocation3], 4294964224 }
  0x2a   :  { %3532 = dma.done.wait [#allocation6], 26624  }
  0x2b   :  { %3533 = vsyncadd [#allocation6], 4294940672  ;;  %v3222_v0 = vld [vmem:[#allocation5 + $0x78] sm:$0xff]   ;;  %v3226_v4 = vld [vmem:[#allocation5 + $0x70] sm:$0xff]   ;;  %v3545_v25 = vmov 1966171168   ;;  %v513_v27 = vlaneseq }
  0x2c   :  { %v3223_v1 = vld [vmem:[#allocation5 + $0xf8] sm:$0xff]   ;;  %2892 = vmatprep.subr.bf16.mxu0 %v3222_v0  ;;  %v3227_v5 = vld [vmem:[#allocation5 + $0xf0] sm:$0xff]   ;;  %v3230_v8 = vld [vmem:[#allocation5 + $0x68] sm:$0xff]   ;;  %v511_v26 = vunpack.c.l.s4 %v3545_v25 }
  0x2d   :  { %v3224_v2 = vld [vmem:[#allocation5 + $0x38] sm:$0xff]   ;;  %2914 = vmatprep.subr.bf16.mxu1 %v3223_v1  ;;  %v3228_v6 = vld [vmem:[#allocation5 + $0x30] sm:$0xff]   ;;  %v3231_v9 = vld [vmem:[#allocation5 + $0xe8] sm:$0xff]   ;;  %v514_v33 = vshrl.u32 %v513_v27, 7 }
  0x2e   :  { %v3225_v3 = vld [vmem:[#allocation5 + $0xb8] sm:$0xff]   ;;  %2893 = vmatpush3.bf16.msra.mxu0 %v3224_v2  ;;  %v3229_v7 = vld [vmem:[#allocation5 + $0xb0] sm:$0xff]   ;;  %v3232_v10 = vld [vmem:[#allocation5 + $0x28] sm:$0xff]   ;;  %v512_v32 = vunpack.c.0.s8 %v511_v26 }
  0x2f   :  { %2915 = vmatpush3.bf16.msra.mxu1 %v3225_v3  ;;  %2894 = vmatprep.subr.bf16.mxu0 %v3226_v4  ;;  %v3233_v11 = vld [vmem:[#allocation5 + $0xa8] sm:$0xff]   ;;  %v3234_v12 = vld [vmem:[#allocation5 + $0x60] sm:$0xff]   ;;  %v3238_v16 = vld [vmem:[#allocation5 + $0x58] sm:$0xff]  }
  0x30   :  { %2916 = vmatprep.subr.bf16.mxu1 %v3227_v5  ;;  %v3235_v13 = vld [vmem:[#allocation5 + $0xe0] sm:$0xff]   ;;  %v3239_v17 = vld [vmem:[#allocation5 + $0xd8] sm:$0xff]   ;;  %v3242_v20 = vld [vmem:[#allocation5 + $0x50] sm:$0xff]   ;;  %v3588_v37 = vsub.s32 %v512_v32, %v514_v33 }
  0x31   :  { %v3236_v14 = vld [vmem:[#allocation5 + $0x20] sm:$0xff]   ;;  %v3240_v18 = vld [vmem:[#allocation5 + $0x18] sm:$0xff]   ;;  %v3243_v21 = vld [vmem:[#allocation5 + $0xd0] sm:$0xff]  }
  0x32   :  { %2895 = vmatpush3.bf16.msra.mxu0 %v3228_v6  ;;  %v3237_v15 = vld [vmem:[#allocation5 + $0xa0] sm:$0xff]   ;;  %v3241_v19 = vld [vmem:[#allocation5 + $0x98] sm:$0xff]   ;;  %v3244_v22 = vld [vmem:[#allocation5 + $0x10] sm:$0xff]  }
  0x33   :  { %2917 = vmatpush3.bf16.msra.mxu1 %v3229_v7  ;;  %2896 = vmatprep.subr.bf16.mxu0 %v3230_v8  ;;  %v3245_v23 = vld [vmem:[#allocation5 + $0x90] sm:$0xff]   ;;  %v3246_v24 = vld [vmem:[#allocation5 + $0x48] sm:$0xff]   ;;  %v3250_v31 = vld [vmem:[#allocation5 + $0x40] sm:$0xff]  }
  0x34   :  { %2918 = vmatprep.subr.bf16.mxu1 %v3231_v9  ;;  %v3247_v28 = vld [vmem:[#allocation5 + $0xc8] sm:$0xff]   ;;  %v3251_v34 = vld [vmem:[#allocation5 + $0xc0] sm:$0xff]   ;;  %v3266_v52 = vld [vmem:[#allocation5 + $0x178] sm:$0xff]  }
  0x35   :  { %v3248_v29 = vld [vmem:[#allocation5 + $0x8] sm:$0xff]   ;;  %v3252_v35 = vld [vmem:[#allocation5] sm:$0xff]   ;;  %v3267_v56 = vld [vmem:[#allocation5 + $0x1f8] sm:$0xff]  }
  0x36   :  { %2897 = vmatpush3.bf16.msra.mxu0 %v3232_v10  ;;  %v3249_v30 = vld [vmem:[#allocation5 + $0x88] sm:$0xff]   ;;  %v3253_v36 = vld [vmem:[#allocation5 + $0x80] sm:$0xff]   ;;  %v3268_v2 = vld [vmem:[#allocation5 + $0x138] sm:$0xff]  }
  0x37   :  { %2919 = vmatpush3.bf16.msra.mxu1 %v3233_v11  ;;  %2898 = vmatprep.subr.bf16.mxu0 %v3234_v12  ;;  %v3254_v38 = vld [vmem:[#allocation2] ss:$24 sps:$4 sm:$0xff]   ;;  %v3256_v39 = vld [vmem:[#allocation2 + $0x4] ss:$24 sps:$4 sm:$0xff]   ;;  %v3257_v40 = vld [vmem:[#allocation2 + $0x30] ss:$24 sps:$4 sm:$0xff]  }
  0x38   :  { %2920 = vmatprep.subr.bf16.mxu1 %v3235_v13  ;;  %v3259_v41 = vld [vmem:[#allocation2 + $0x34] ss:$24 sps:$4 sm:$0xff]   ;;  %v3260_v42 = vld [vmem:[#allocation2 + $0x60] ss:$24 sps:$4 sm:$0xff]   ;;  %v3262_v43 = vld [vmem:[#allocation2 + $0x64] ss:$24 sps:$4 sm:$0xff]   ;;  %v516_v45 = vrot.slane %v3254_v38, %v3588_v37  ;;  %v530_v47 = vrot.slane %v3257_v40, %v3588_v37  ;;  %v3593_v48 = vrot.slane %v3256_v39, %v3588_v37 }
  0x39   :  { %v3263_v44 = vld [vmem:[#allocation2 + $0x90] ss:$24 sps:$4 sm:$0xff]   ;;  %v3265_v46 = vld [vmem:[#allocation2 + $0x94] ss:$24 sps:$4 sm:$0xff]   ;;  %v3596_v49 = vrot.slane %v3259_v41, %v3588_v37  ;;  %v544_v50 = vrot.slane %v3260_v42, %v3588_v37  ;;  %v3601_v53 = vrot.slane %v3262_v43, %v3588_v37  ;;  %v3269_v4 = vld [vmem:[#allocation5 + $0x1b8] sm:$0xff]  }
  0x3a   :  { %2899 = vmatpush3.bf16.msra.mxu0 %v3236_v14  ;;  %v558_v51 = vrot.slane %v3263_v44, %v3588_v37  ;;  %v567_v54 = vcombine.high %v516_v45, %v530_v47  ;;  %v566_v55 = vcombine.low %v516_v45, %v530_v47  ;;  %v3604_v57 = vrot.slane %v3265_v46, %v3588_v37  ;;  %v3270_v10 = vld [vmem:[#allocation5 + $0x170] sm:$0xff]   ;;  %v3283_v25 = vld [vmem:[#allocation5 + $0x1d8] sm:$0xff]   ;;  %v3290_v32 = vld [vmem:[#allocation5 + $0x148] sm:$0xff]  }
  0x3b   :  { %2921 = vmatpush3.bf16.msra.mxu1 %v3237_v15  ;;  %2900 = vmatprep.subr.bf16.mxu0 %v3238_v16  ;;  %v569_v58 = vcombine.high %v3593_v48, %v3596_v49  ;;  %v3271_v11 = vld [vmem:[#allocation5 + $0x1f0] sm:$0xff]   ;;  %v3274_v16 = vld [vmem:[#allocation5 + $0x168] sm:$0xff]   ;;  %v3284_v26 = vld [vmem:[#allocation5 + $0x118] sm:$0xff]  }
  0x3c   :  { %2922 = vmatprep.subr.bf16.mxu1 %v3239_v17  ;;  %v571_v59 = vcombine.high %v544_v50, %v558_v51  ;;  %v570_v60 = vcombine.low %v544_v50, %v558_v51  ;;  %v594_v61 = vrot.slane %v567_v54, %v3588_v37  ;;  %v580_v62 = vrot.slane %v566_v55, %v3588_v37  ;;  %v3272_v12 = vld [vmem:[#allocation5 + $0x130] sm:$0xff]   ;;  %v3275_v17 = vld [vmem:[#allocation5 + $0x1e8] sm:$0xff]   ;;  %v3285_v27 = vld [vmem:[#allocation5 + $0x198] sm:$0xff]  }
  0x3d   :  { %v573_v63 = vcombine.high %v3601_v53, %v3604_v57  ;;  %v601_v3 = vrot.slane %v569_v58, %v3588_v37  ;;  %v3273_v15 = vld [vmem:[#allocation5 + $0x1b0] sm:$0xff]   ;;  %v3291_v33 = vld [vmem:[#allocation5 + $0x1c8] sm:$0xff]   ;;  %v572_v38 = vcombine.low %v3601_v53, %v3604_v57  ;;  %v3294_v39 = vld [vmem:[#allocation5 + $0x140] sm:$0xff]  }
  0x3e   :  { %2901 = vmatpush3.bf16.msra.mxu0 %v3240_v18  ;;  %v622_v0 = vrot.slane %v571_v59, %v3588_v37  ;;  %v608_v1 = vrot.slane %v570_v60, %v3588_v37  ;;  %v3276_v18 = vld [vmem:[#allocation5 + $0x128] sm:$0xff]   ;;  %v3295_v40 = vld [vmem:[#allocation5 + $0x1c0] sm:$0xff]   ;;  %v3298_v45 = vld [vmem:[#allocation5 + $0x278] sm:$0xff]  }
  0x3f   :  { %2923 = vmatpush3.bf16.msra.mxu1 %v3241_v19  ;;  %2902 = vmatprep.subr.bf16.mxu0 %v3242_v20  ;;  %v629_v5 = vrot.slane %v573_v63, %v3588_v37  ;;  %v3277_v19 = vld [vmem:[#allocation5 + $0x1a8] sm:$0xff]   ;;  %v3278_v20 = vld [vmem:[#allocation5 + $0x160] sm:$0xff]   ;;  %v615_v44 = vrot.slane %v572_v38, %v3588_v37  ;;  %v3299_v46 = vld [vmem:[#allocation5 + $0x2f8] sm:$0xff]  }
  0x40   :  { %2924 = vmatprep.subr.bf16.mxu1 %v3243_v21  ;;  %v634_v6 = vcombine.low %v594_v61, %v622_v0  ;;  %v635_v7 = vcombine.high %v594_v61, %v622_v0  ;;  %v630_v8 = vcombine.low %v580_v62, %v608_v1  ;;  %v631_v9 = vcombine.high %v580_v62, %v608_v1  ;;  %v3279_v21 = vld [vmem:[#allocation5 + $0x1e0] sm:$0xff]   ;;  %v3300_v47 = vld [vmem:[#allocation5 + $0x238] sm:$0xff]   ;;  %v3302_v51 = vld [vmem:[#allocation5 + $0x270] sm:$0xff]  }
  0x41   :  { %v636_v13 = vcombine.low %v601_v3, %v629_v5  ;;  %v637_v14 = vcombine.high %v601_v3, %v629_v5  ;;  %v3296_v41 = vld [vmem:[#allocation5 + $0x100] sm:$0xff]   ;;  %v3301_v50 = vld [vmem:[#allocation5 + $0x2b8] sm:$0xff]   ;;  %v3304_v53 = vld [vmem:[#allocation5 + $0x230] sm:$0xff]  }
  0x42   :  { %2903 = vmatpush3.bf16.msra.mxu0 %v3244_v22  ;;  %2118 = vmatprep.mubr.bf16.mxu0 %v634_v6  ;;  %v3280_v22 = vld [vmem:[#allocation5 + $0x120] sm:$0xff]   ;;  %v3305_v54 = vld [vmem:[#allocation5 + $0x2b0] sm:$0xff]   ;;  %v3306_v55 = vld [vmem:[#allocation5 + $0x268] sm:$0xff]  }
  0x43   :  { %2925 = vmatpush3.bf16.msra.mxu1 %v3245_v23  ;;  %2904 = vmatprep.subr.bf16.mxu0 %v3246_v24  ;;  %v3281_v23 = vld [vmem:[#allocation5 + $0x1a0] sm:$0xff]   ;;  %v3282_v24 = vld [vmem:[#allocation5 + $0x158] sm:$0xff]   ;;  %v3308_v57 = vld [vmem:[#allocation5 + $0x228] sm:$0xff]  }
  0x44   :  { %2926 = vmatprep.subr.bf16.mxu1 %v3247_v28  ;;  %2159 = vmatprep.mubr.bf16.mxu1 %v635_v7  ;;  %v3286_v28 = vld [vmem:[#allocation5 + $0x150] sm:$0xff]   ;;  %v3297_v42 = vld [vmem:[#allocation5 + $0x180] sm:$0xff]   ;;  %v3309_v58 = vld [vmem:[#allocation5 + $0x2a8] sm:$0xff]  }
  0x45   :  { %v3310_v59 = vld [vmem:[#allocation5 + $0x260] sm:$0xff]   ;;  %v3314_v63 = vld [vmem:[#allocation5 + $0x258] sm:$0xff]   ;;  %v3318_v3 = vld [vmem:[#allocation5 + $0x250] sm:$0xff]  }
  0x46   :  { %2905 = vmatpush3.bf16.msra.mxu0 %v3248_v29  ;;  %v3287_v29 = vld [vmem:[#allocation5 + $0x1d0] sm:$0xff]   ;;  %v3311_v60 = vld [vmem:[#allocation5 + $0x2e0] sm:$0xff]   ;;  %v3315_v0 = vld [vmem:[#allocation5 + $0x2d8] sm:$0xff]  }
  0x47   :  { %2927 = vmatpush3.bf16.msra.mxu1 %v3249_v30  ;;  %2906 = vmatprep.subr.bf16.mxu0 %v3250_v31  ;;  %v3288_v30 = vld [vmem:[#allocation5 + $0x110] sm:$0xff]   ;;  %v3312_v61 = vld [vmem:[#allocation5 + $0x220] sm:$0xff]   ;;  %v3316_v1 = vld [vmem:[#allocation5 + $0x218] sm:$0xff]  }
  0x48   :  { %2928 = vmatprep.subr.bf16.mxu1 %v3251_v34  ;;  %v3289_v31 = vld [vmem:[#allocation5 + $0x190] sm:$0xff]   ;;  %v3292_v34 = vld [vmem:[#allocation5 + $0x108] sm:$0xff]   ;;  %v3313_v62 = vld [vmem:[#allocation5 + $0x2a0] sm:$0xff]  }
  0x49   :  { %v3320_v5 = vld [vmem:[#allocation5 + $0x210] sm:$0xff]   ;;  %v3322_v7 = vld [vmem:[#allocation5 + $0x248] sm:$0xff]  }
  0x4a   :  { %2907 = vmatpush3.bf16.msra.mxu0 %v3252_v35  ;;  %v3293_v35 = vld [vmem:[#allocation5 + $0x188] sm:$0xff]   ;;  %v3321_v6 = vld [vmem:[#allocation5 + $0x290] sm:$0xff]  }
  0x4b   :  { %2929 = vmatpush3.bf16.msra.mxu1 %v3253_v36  ;;  %2936 = vmatprep.subr.bf16.mxu0 %v3266_v52  ;;  %v568_v36 = vcombine.low %v3593_v48, %v3596_v49  ;;  %v3303_v52 = vld [vmem:[#allocation5 + $0x2f0] sm:$0xff]  }
  0x4c   :  { %2958 = vmatprep.subr.bf16.mxu1 %v3267_v56  ;;  %v3307_v56 = vld [vmem:[#allocation5 + $0x2e8] sm:$0xff]  }
  0x4d   :  { %2119 = vmatmul.mubr.bf16.vlgmr.msra.gmra.mxu0 %v630_v8  ;;  %v587_v43 = vrot.slane %v568_v36, %v3588_v37  ;;  %v3323_v8 = vld [vmem:[#allocation5 + $0x2c8] sm:$0xff]  }
  0x4e   :  { %2160 = vmatmul.mubr.bf16.vlgmr.msra.gmra.mxu1 %v631_v9  ;;  %2937 = vmatpush3.bf16.msra.mxu0 %v3268_v2  ;;  %v3317_v2 = vld [vmem:[#allocation5 + $0x298] sm:$0xff]   ;;  %v3324_v9 = vld [vmem:[#allocation5 + $0x208] sm:$0xff]  }
  0x4f   :  { %2959 = vmatpush3.bf16.msra.mxu1 %v3269_v4  ;;  %2938 = vmatprep.subr.bf16.mxu0 %v3270_v10  ;;  %v632_v48 = vcombine.low %v587_v43, %v615_v44  ;;  %v633_v49 = vcombine.high %v587_v43, %v615_v44  ;;  %v3319_v4 = vld [vmem:[#allocation5 + $0x2d0] sm:$0xff]   ;;  %v3325_v10 = vld [vmem:[#allocation5 + $0x288] sm:$0xff]  }
  0x50   :  { %2960 = vmatprep.subr.bf16.mxu1 %v3271_v11  ;;  %2200 = vmatprep.mubr.bf16.mxu0 %v636_v13  ;;  %v3326_v11 = vld [vmem:[#allocation5 + $0x240] sm:$0xff]   ;;  %v3345_v43 = vld [vmem:[#allocation5 + $0x3b0] sm:$0xff]   ;;  %v3346_v44 = vld [vmem:[#allocation5 + $0x368] sm:$0xff]  }
  0x51   :  { %2241 = vmatprep.mubr.bf16.mxu1 %v637_v14  ;;  %v3328_v13 = vld [vmem:[#allocation5 + $0x200] sm:$0xff]  }
  0x52   :  { %2939 = vmatpush3.bf16.msra.mxu0 %v3272_v12  ;;  %v3327_v12 = vld [vmem:[#allocation5 + $0x2c0] sm:$0xff]  }
  0x53   :  { %2961 = vmatpush3.bf16.msra.mxu1 %v3273_v15  ;;  %2940 = vmatprep.subr.bf16.mxu0 %v3274_v16  ;;  %v3329_v14 = vld [vmem:[#allocation5 + $0x280] sm:$0xff]   ;;  %v3332_v16 = vld [vmem:[#allocation2 + $0x38] ss:$24 sps:$4 sm:$0xff]  }
  0x54   :  { %2962 = vmatprep.subr.bf16.mxu1 %v3275_v17  ;;  %v3330_v15 = vld [vmem:[#allocation2 + $0x8] ss:$24 sps:$4 sm:$0xff]  }
  0x55   :  { %v3334_v17 = vld [vmem:[#allocation2 + $0x68] ss:$24 sps:$4 sm:$0xff]  }
  0x56   :  { %2941 = vmatpush3.bf16.msra.mxu0 %v3276_v18  ;;  %v3336_v18 = vld [vmem:[#allocation2 + $0x98] ss:$24 sps:$4 sm:$0xff]  }
  0x57   :  { %2963 = vmatpush3.bf16.msra.mxu1 %v3277_v19  ;;  %2942 = vmatprep.subr.bf16.mxu0 %v3278_v20  ;;  %v652_v19 = vrot.slane %v3330_v15, %v3588_v37  ;;  %v666_v20 = vrot.slane %v3332_v16, %v3588_v37  ;;  %v3374_v16 = vld [vmem:[#allocation5 + $0x478] sm:$0xff]  }
  0x58   :  { %2964 = vmatprep.subr.bf16.mxu1 %v3279_v21  ;;  %v680_v21 = vrot.slane %v3334_v17, %v3588_v37 }
  0x5a   :  { %2943 = vmatpush3.bf16.msra.mxu0 %v3280_v22  ;;  %v3338_v22 = vld [vmem:[#allocation5 + $0x378] sm:$0xff]  }
  0x5b   :  { %2965 = vmatpush3.bf16.msra.mxu1 %v3281_v23  ;;  %2944 = vmatprep.subr.bf16.mxu0 %v3282_v24  ;;  %v694_v23 = vrot.slane %v3336_v18, %v3588_v37  ;;  %v3339_v24 = vld [vmem:[#allocation5 + $0x3f8] sm:$0xff]  }
  0x5c   :  { %2966 = vmatprep.subr.bf16.mxu1 %v3283_v25  ;;  %v703_v25 = vcombine.high %v652_v19, %v666_v20 }
  0x5e   :  { %2945 = vmatpush3.bf16.msra.mxu0 %v3284_v26  ;;  %v702_v26 = vcombine.low %v652_v19, %v666_v20  ;;  %v3375_v19 = vld [vmem:[#allocation5 + $0x4f8] sm:$0xff]  }
  0x5f   :  { %2967 = vmatpush3.bf16.msra.mxu1 %v3285_v27  ;;  %2946 = vmatprep.subr.bf16.mxu0 %v3286_v28  ;;  %v707_v27 = vcombine.high %v680_v21, %v694_v23  ;;  %v706_v28 = vcombine.low %v680_v21, %v694_v23  ;;  %v3377_v23 = vld [vmem:[#allocation5 + $0x4b8] sm:$0xff]  }
  0x60   :  { %2968 = vmatprep.subr.bf16.mxu1 %v3287_v29  ;;  %v730_v29 = vrot.slane %v703_v25, %v3588_v37 }
  0x62   :  { %2947 = vmatpush3.bf16.msra.mxu0 %v3288_v30  ;;  %v716_v30 = vrot.slane %v702_v26, %v3588_v37 }
  0x63   :  { %2969 = vmatpush3.bf16.msra.mxu1 %v3289_v31  ;;  %2948 = vmatprep.subr.bf16.mxu0 %v3290_v32  ;;  %v758_v31 = vrot.slane %v707_v27, %v3588_v37  ;;  %v744_v32 = vrot.slane %v706_v28, %v3588_v37  ;;  %v3378_v28 = vld [vmem:[#allocation5 + $0x470] sm:$0xff]  }
  0x64   :  { %2970 = vmatprep.subr.bf16.mxu1 %v3291_v33  ;;  %v3340_v33 = vld [vmem:[#allocation5 + $0x338] sm:$0xff]  }
  0x65   :  { %v771_v36 = vcombine.high %v730_v29, %v758_v31  ;;  %v766_v38 = vcombine.low %v716_v30, %v744_v32 }
  0x66   :  { %2949 = vmatpush3.bf16.msra.mxu0 %v3292_v34  ;;  %v3341_v34 = vld [vmem:[#allocation5 + $0x3b8] sm:$0xff]  }
  0x67   :  { %2971 = vmatpush3.bf16.msra.mxu1 %v3293_v35  ;;  %2950 = vmatprep.subr.bf16.mxu0 %v3294_v39  ;;  %v770_v35 = vcombine.low %v730_v29, %v758_v31  ;;  %v767_v39 = vcombine.high %v716_v30, %v744_v32  ;;  %v3379_v29 = vld [vmem:[#allocation5 + $0x4f0] sm:$0xff]   ;;  %v3382_v32 = vld [vmem:[#allocation5 + $0x468] sm:$0xff]  }
  0x68   :  { %2972 = vmatprep.subr.bf16.mxu1 %v3295_v40  ;;  %v3342_v40 = vld [vmem:[#allocation5 + $0x370] sm:$0xff]  }
  0x69   :  { %v3380_v30 = vld [vmem:[#allocation5 + $0x430] sm:$0xff]  }
  0x6a   :  { %2951 = vmatpush3.bf16.msra.mxu0 %v3296_v41  ;;  %v3343_v41 = vld [vmem:[#allocation5 + $0x3f0] sm:$0xff]  }
  0x6b   :  { %2973 = vmatpush3.bf16.msra.mxu1 %v3297_v42  ;;  %2980 = vmatprep.subr.bf16.mxu0 %v3298_v45  ;;  %v3344_v42 = vld [vmem:[#allocation5 + $0x330] sm:$0xff]   ;;  %v3347_v45 = vld [vmem:[#allocation5 + $0x3e8] sm:$0xff]  }
  0x6c   :  { %3002 = vmatprep.subr.bf16.mxu1 %v3299_v46  ;;  %v3348_v46 = vld [vmem:[#allocation5 + $0x328] sm:$0xff]   ;;  %v3381_v31 = vld [vmem:[#allocation5 + $0x4b0] sm:$0xff]  }
  0x6d   :  { %2201 = vmatmul.mubr.bf16.vlgmr.msra.gmra.mxu0 %v632_v48  ;;  %v3350_v48 = vld [vmem:[#allocation5 + $0x360] sm:$0xff]  }
  0x6e   :  { %2242 = vmatmul.mubr.bf16.vlgmr.msra.gmra.mxu1 %v633_v49  ;;  %2981 = vmatpush3.bf16.msra.mxu0 %v3300_v47  ;;  %v3349_v47 = vld [vmem:[#allocation5 + $0x3a8] sm:$0xff]   ;;  %v3351_v49 = vld [vmem:[#allocation5 + $0x3e0] sm:$0xff]  }
  0x6f   :  { %3003 = vmatpush3.bf16.msra.mxu1 %v3301_v50  ;;  %2982 = vmatprep.subr.bf16.mxu0 %v3302_v51  ;;  %v3352_v50 = vld [vmem:[#allocation5 + $0x320] sm:$0xff]  }
  0x70   :  { %3004 = vmatprep.subr.bf16.mxu1 %v3303_v52  ;;  %2282 = vmatprep.mubr.bf16.mxu0 %v770_v35  ;;  %v3353_v51 = vld [vmem:[#allocation5 + $0x3a0] sm:$0xff]   ;;  %v3354_v52 = vld [vmem:[#allocation5 + $0x358] sm:$0xff]   ;;  %v3385_v35 = vld [vmem:[#allocation5 + $0x4a8] sm:$0xff]  }
  0x71   :  { %2323 = vmatprep.mubr.bf16.mxu1 %v771_v36  ;;  %v3386_v36 = vld [vmem:[#allocation5 + $0x460] sm:$0xff]  }
  0x72   :  { %2983 = vmatpush3.bf16.msra.mxu0 %v3304_v53  ;;  %v3355_v53 = vld [vmem:[#allocation5 + $0x3d8] sm:$0xff]  }
  0x73   :  { %3005 = vmatpush3.bf16.msra.mxu1 %v3305_v54  ;;  %2984 = vmatprep.subr.bf16.mxu0 %v3306_v55  ;;  %v3356_v54 = vld [vmem:[#allocation5 + $0x318] sm:$0xff]  }
  0x74   :  { %3006 = vmatprep.subr.bf16.mxu1 %v3307_v56  ;;  %v3357_v55 = vld [vmem:[#allocation5 + $0x398] sm:$0xff]   ;;  %v3358_v56 = vld [vmem:[#allocation5 + $0x350] sm:$0xff]  }
  0x76   :  { %2985 = vmatpush3.bf16.msra.mxu0 %v3308_v57  ;;  %v3359_v57 = vld [vmem:[#allocation5 + $0x3d0] sm:$0xff]  }
  0x77   :  { %3007 = vmatpush3.bf16.msra.mxu1 %v3309_v58  ;;  %2986 = vmatprep.subr.bf16.mxu0 %v3310_v59  ;;  %v3360_v58 = vld [vmem:[#allocation5 + $0x310] sm:$0xff]  }
  0x78   :  { %3008 = vmatprep.subr.bf16.mxu1 %v3311_v60  ;;  %v3361_v59 = vld [vmem:[#allocation5 + $0x390] sm:$0xff]   ;;  %v3362_v60 = vld [vmem:[#allocation5 + $0x348] sm:$0xff]  }
  0x7a   :  { %2987 = vmatpush3.bf16.msra.mxu0 %v3312_v61  ;;  %v3363_v61 = vld [vmem:[#allocation5 + $0x3c8] sm:$0xff]  }
  0x7b   :  { %3009 = vmatpush3.bf16.msra.mxu1 %v3313_v62  ;;  %2988 = vmatprep.subr.bf16.mxu0 %v3314_v63  ;;  %v3364_v62 = vld [vmem:[#allocation5 + $0x308] sm:$0xff]  }
  0x7c   :  { %3010 = vmatprep.subr.bf16.mxu1 %v3315_v0  ;;  %v3365_v63 = vld [vmem:[#allocation5 + $0x388] sm:$0xff]   ;;  %v3366_v0 = vld [vmem:[#allocation5 + $0x340] sm:$0xff]  }
  0x7e   :  { %2989 = vmatpush3.bf16.msra.mxu0 %v3316_v1  ;;  %v3367_v1 = vld [vmem:[#allocation5 + $0x3c0] sm:$0xff]  }
  0x7f   :  { %3011 = vmatpush3.bf16.msra.mxu1 %v3317_v2  ;;  %2990 = vmatprep.subr.bf16.mxu0 %v3318_v3  ;;  %v3370_v2 = vld [vmem:[#allocation2 + $0xc] ss:$24 sps:$4 sm:$0xff]   ;;  %v3371_v3 = vld [vmem:[#allocation2 + $0x3c] ss:$24 sps:$4 sm:$0xff]  }
  0x80   :  { %3012 = vmatprep.subr.bf16.mxu1 %v3319_v4  ;;  %v3372_v4 = vld [vmem:[#allocation2 + $0x6c] ss:$24 sps:$4 sm:$0xff]  }
  0x82   :  { %2991 = vmatpush3.bf16.msra.mxu0 %v3320_v5  ;;  %v3373_v5 = vld [vmem:[#allocation2 + $0x9c] ss:$24 sps:$4 sm:$0xff]  }
  0x83   :  { %3013 = vmatpush3.bf16.msra.mxu1 %v3321_v6  ;;  %2992 = vmatprep.subr.bf16.mxu0 %v3322_v7  ;;  %v659_v6 = vrot.slane %v3370_v2, %v3588_v37  ;;  %v673_v7 = vrot.slane %v3371_v3, %v3588_v37  ;;  %v3415_v2 = vld [vmem:[#allocation5 + $0x5f8] sm:$0xff]  }
  0x84   :  { %3014 = vmatprep.subr.bf16.mxu1 %v3323_v8  ;;  %v3368_v8 = vld [vmem:[#allocation5 + $0x300] sm:$0xff]  }
  0x86   :  { %2993 = vmatpush3.bf16.msra.mxu0 %v3324_v9  ;;  %v687_v9 = vrot.slane %v3372_v4, %v3588_v37 }
  0x87   :  { %3015 = vmatpush3.bf16.msra.mxu1 %v3325_v10  ;;  %2994 = vmatprep.subr.bf16.mxu0 %v3326_v11  ;;  %v701_v10 = vrot.slane %v3373_v5, %v3588_v37  ;;  %v3369_v11 = vld [vmem:[#allocation5 + $0x380] sm:$0xff]  }
  0x88   :  { %3016 = vmatprep.subr.bf16.mxu1 %v3327_v12  ;;  %v705_v12 = vcombine.high %v659_v6, %v673_v7 }
  0x89   :  { %v708_v15 = vcombine.low %v687_v9, %v701_v10 }
  0x8a   :  { %2995 = vmatpush3.bf16.msra.mxu0 %v3328_v13  ;;  %v704_v13 = vcombine.low %v659_v6, %v673_v7  ;;  %v737_v17 = vrot.slane %v705_v12, %v3588_v37  ;;  %v3417_v12 = vld [vmem:[#allocation5 + $0x5b8] sm:$0xff]  }
  0x8b   :  { %3017 = vmatpush3.bf16.msra.mxu1 %v3329_v14  ;;  %3024 = vmatprep.subr.bf16.mxu0 %v3338_v22  ;;  %v709_v14 = vcombine.high %v687_v9, %v701_v10  ;;  %v751_v21 = vrot.slane %v708_v15, %v3588_v37  ;;  %v3376_v22 = vld [vmem:[#allocation5 + $0x438] sm:$0xff]  }
  0x8c   :  { %3046 = vmatprep.subr.bf16.mxu1 %v3339_v24  ;;  %v723_v18 = vrot.slane %v704_v13, %v3588_v37 }
  0x8d   :  { %2283 = vmatmul.mubr.bf16.vlgmr.msra.gmra.mxu0 %v766_v38  ;;  %v765_v20 = vrot.slane %v709_v14, %v3588_v37  ;;  %v3387_v38 = vld [vmem:[#allocation5 + $0x4e0] sm:$0xff]  }
  0x8e   :  { %2324 = vmatmul.mubr.bf16.vlgmr.msra.gmra.mxu1 %v767_v39  ;;  %3025 = vmatpush3.bf16.msra.mxu0 %v3340_v33  ;;  %v768_v26 = vcombine.low %v723_v18, %v751_v21  ;;  %v769_v27 = vcombine.high %v723_v18, %v751_v21  ;;  %v3383_v33 = vld [vmem:[#allocation5 + $0x4e8] sm:$0xff]   ;;  %v3388_v39 = vld [vmem:[#allocation5 + $0x420] sm:$0xff]   ;;  %v3419_v18 = vld [vmem:[#allocation5 + $0x5f0] sm:$0xff]  }
  0x8f   :  { %3047 = vmatpush3.bf16.msra.mxu1 %v3341_v34  ;;  %3026 = vmatprep.subr.bf16.mxu0 %v3342_v40  ;;  %v772_v24 = vcombine.low %v737_v17, %v765_v20  ;;  %v773_v25 = vcombine.high %v737_v17, %v765_v20  ;;  %v3384_v34 = vld [vmem:[#allocation5 + $0x428] sm:$0xff]   ;;  %v3389_v40 = vld [vmem:[#allocation5 + $0x4a0] sm:$0xff]   ;;  %v3418_v17 = vld [vmem:[#allocation5 + $0x570] sm:$0xff]  }
  0x90   :  { %3048 = vmatprep.subr.bf16.mxu1 %v3343_v41  ;;  %v3390_v41 = vld [vmem:[#allocation5 + $0x458] sm:$0xff]   ;;  %v3421_v20 = vld [vmem:[#allocation5 + $0x5b0] sm:$0xff]   ;;  %v3422_v21 = vld [vmem:[#allocation5 + $0x568] sm:$0xff]  }
  0x91   :  { %2364 = vmatprep.mubr.bf16.mxu0 %v772_v24  ;;  %2405 = vmatprep.mubr.bf16.mxu1 %v773_v25  ;;  %v3425_v24 = vld [vmem:[#allocation5 + $0x5a8] sm:$0xff]   ;;  %v3426_v25 = vld [vmem:[#allocation5 + $0x560] sm:$0xff]  }
  0x92   :  { %3027 = vmatpush3.bf16.msra.mxu0 %v3344_v42  ;;  %v3391_v42 = vld [vmem:[#allocation5 + $0x4d8] sm:$0xff]  }
  0x93   :  { %3049 = vmatpush3.bf16.msra.mxu1 %v3345_v43  ;;  %3028 = vmatprep.subr.bf16.mxu0 %v3346_v44  ;;  %v3392_v43 = vld [vmem:[#allocation5 + $0x418] sm:$0xff]  }
  0x94   :  { %3050 = vmatprep.subr.bf16.mxu1 %v3347_v45  ;;  %v3393_v44 = vld [vmem:[#allocation5 + $0x498] sm:$0xff]   ;;  %v3394_v45 = vld [vmem:[#allocation5 + $0x450] sm:$0xff]  }
  0x96   :  { %3029 = vmatpush3.bf16.msra.mxu0 %v3348_v46  ;;  %v3395_v46 = vld [vmem:[#allocation5 + $0x4d0] sm:$0xff]  }
  0x97   :  { %3051 = vmatpush3.bf16.msra.mxu1 %v3349_v47  ;;  %3030 = vmatprep.subr.bf16.mxu0 %v3350_v48  ;;  %v3396_v47 = vld [vmem:[#allocation5 + $0x410] sm:$0xff]  }
  0x98   :  { %3052 = vmatprep.subr.bf16.mxu1 %v3351_v49  ;;  %v3397_v48 = vld [vmem:[#allocation5 + $0x490] sm:$0xff]   ;;  %v3398_v49 = vld [vmem:[#allocation5 + $0x448] sm:$0xff]  }
  0x9a   :  { %3031 = vmatpush3.bf16.msra.mxu0 %v3352_v50  ;;  %v3399_v50 = vld [vmem:[#allocation5 + $0x4c8] sm:$0xff]  }
  0x9b   :  { %3053 = vmatpush3.bf16.msra.mxu1 %v3353_v51  ;;  %3032 = vmatprep.subr.bf16.mxu0 %v3354_v52  ;;  %v3400_v51 = vld [vmem:[#allocation5 + $0x408] sm:$0xff]  }
  0x9c   :  { %3054 = vmatprep.subr.bf16.mxu1 %v3355_v53  ;;  %v3401_v52 = vld [vmem:[#allocation5 + $0x488] sm:$0xff]   ;;  %v3402_v53 = vld [vmem:[#allocation5 + $0x440] sm:$0xff]  }
  0x9e   :  { %3033 = vmatpush3.bf16.msra.mxu0 %v3356_v54  ;;  %v3403_v54 = vld [vmem:[#allocation5 + $0x4c0] sm:$0xff]  }
  0x9f   :  { %3055 = vmatpush3.bf16.msra.mxu1 %v3357_v55  ;;  %3034 = vmatprep.subr.bf16.mxu0 %v3358_v56  ;;  %v3404_v55 = vld [vmem:[#allocation5 + $0x400] sm:$0xff]  }
  0xa0   :  { %3056 = vmatprep.subr.bf16.mxu1 %v3359_v57  ;;  %v3405_v56 = vld [vmem:[#allocation5 + $0x480] sm:$0xff]   ;;  %v3406_v57 = vld [vmem:[#allocation2 + $0x10] ss:$24 sps:$4 sm:$0xff]  }
  0xa2   :  { %3035 = vmatpush3.bf16.msra.mxu0 %v3360_v58  ;;  %v3408_v58 = vld [vmem:[#allocation2 + $0x40] ss:$24 sps:$4 sm:$0xff]  }
  0xa3   :  { %3057 = vmatpush3.bf16.msra.mxu1 %v3361_v59  ;;  %3036 = vmatprep.subr.bf16.mxu0 %v3362_v60  ;;  %v3410_v59 = vld [vmem:[#allocation2 + $0x70] ss:$24 sps:$4 sm:$0xff]   ;;  %v3412_v60 = vld [vmem:[#allocation2 + $0xa0] ss:$24 sps:$4 sm:$0xff]  }
  0xa4   :  { %3058 = vmatprep.subr.bf16.mxu1 %v3363_v61  ;;  %v788_v61 = vrot.slane %v3406_v57, %v3588_v37 }
  0xa6   :  { %3037 = vmatpush3.bf16.msra.mxu0 %v3364_v62  ;;  %v802_v62 = vrot.slane %v3408_v58, %v3588_v37 }
  0xa7   :  { %3059 = vmatpush3.bf16.msra.mxu1 %v3365_v63  ;;  %3038 = vmatprep.subr.bf16.mxu0 %v3366_v0  ;;  %v3414_v63 = vld [vmem:[#allocation5 + $0x578] sm:$0xff]   ;;  %v816_v0 = vrot.slane %v3410_v59, %v3588_v37 }
  0xa8   :  { %3060 = vmatprep.subr.bf16.mxu1 %v3367_v1  ;;  %v830_v1 = vrot.slane %v3412_v60, %v3588_v37  ;;  %v839_v3 = vcombine.high %v788_v61, %v802_v62  ;;  %v838_v4 = vcombine.low %v788_v61, %v802_v62 }
  0xaa   :  { %3039 = vmatpush3.bf16.msra.mxu0 %v3368_v8  ;;  %v843_v5 = vcombine.high %v816_v0, %v830_v1  ;;  %v842_v6 = vcombine.low %v816_v0, %v830_v1  ;;  %v866_v7 = vrot.slane %v839_v3, %v3588_v37  ;;  %v852_v8 = vrot.slane %v838_v4, %v3588_v37  ;;  %v2594_v3 = vld [vmem:[#allocation7 + $0x70] sm:$0xff]  ;;  %v2593_v4 = vld [vmem:[#allocation7 + $0x68] sm:$0xff] }
  0xab   :  { %3061 = vmatpush3.bf16.msra.mxu1 %v3369_v11  ;;  %3068 = vmatprep.subr.bf16.mxu0 %v3374_v16  ;;  %v3416_v11 = vld [vmem:[#allocation5 + $0x538] sm:$0xff]  }
  0xac   :  { %3090 = vmatprep.subr.bf16.mxu1 %v3375_v19  ;;  %v894_v9 = vrot.slane %v843_v5, %v3588_v37  ;;  %v880_v10 = vrot.slane %v842_v6, %v3588_v37  ;;  %v3420_v19 = vld [vmem:[#allocation5 + $0x530] sm:$0xff]   ;;  %v2592_v5 = vld [vmem:[#allocation7 + $0x60] sm:$0xff]  ;;  %v2591_v6 = vld [vmem:[#allocation7 + $0x58] sm:$0xff] }
  0xad   :  { %2365 = vmatmul.mubr.bf16.vlgmr.msra.gmra.mxu0 %v768_v26  ;;  %v3427_v26 = vld [vmem:[#allocation5 + $0x5e0] sm:$0xff]  }
  0xae   :  { %2406 = vmatmul.mubr.bf16.vlgmr.msra.gmra.mxu1 %v769_v27  ;;  %3069 = vmatpush3.bf16.msra.mxu0 %v3376_v22  ;;  %v906_v13 = vcombine.low %v866_v7, %v894_v9  ;;  %v907_v14 = vcombine.high %v866_v7, %v894_v9  ;;  %v902_v15 = vcombine.low %v852_v8, %v880_v10  ;;  %v3423_v22 = vld [vmem:[#allocation5 + $0x5e8] sm:$0xff]   ;;  %v3428_v27 = vld [vmem:[#allocation5 + $0x520] sm:$0xff]   ;;  %v2587_v9 = vld [vmem:[#allocation7 + $0x38] sm:$0xff] }
  0xaf   :  { %3091 = vmatpush3.bf16.msra.mxu1 %v3377_v23  ;;  %3070 = vmatprep.subr.bf16.mxu0 %v3378_v28  ;;  %v903_v16 = vcombine.high %v852_v8, %v880_v10  ;;  %v3424_v23 = vld [vmem:[#allocation5 + $0x528] sm:$0xff]   ;;  %v3429_v28 = vld [vmem:[#allocation5 + $0x5a0] sm:$0xff]   ;;  %v2586_v10 = vld [vmem:[#allocation7 + $0x30] sm:$0xff] }
  0xb0   :  { %3092 = vmatprep.subr.bf16.mxu1 %v3379_v29  ;;  %2446 = vmatprep.mubr.bf16.mxu0 %v906_v13  ;;  %v3430_v29 = vld [vmem:[#allocation5 + $0x558] sm:$0xff]   ;;  %v2589_v7 = vld [vmem:[#allocation7 + $0x48] sm:$0xff]  ;;  %v2588_v8 = vld [vmem:[#allocation7 + $0x40] sm:$0xff] }
  0xb1   :  { %2487 = vmatprep.mubr.bf16.mxu1 %v907_v14  ;;  %v2583_v13 = vld [vmem:[#allocation7 + $0x18] sm:$0xff]  ;;  %v2582_v14 = vld [vmem:[#allocation7 + $0x10] sm:$0xff] }
  0xb2   :  { %3071 = vmatpush3.bf16.msra.mxu0 %v3380_v30  ;;  %v3431_v30 = vld [vmem:[#allocation5 + $0x5d8] sm:$0xff]  }
  0xb3   :  { %3093 = vmatpush3.bf16.msra.mxu1 %v3381_v31  ;;  %3072 = vmatprep.subr.bf16.mxu0 %v3382_v32  ;;  %v3432_v31 = vld [vmem:[#allocation5 + $0x518] sm:$0xff]  }
  0xb4   :  { %3094 = vmatprep.subr.bf16.mxu1 %v3383_v33  ;;  %v3433_v32 = vld [vmem:[#allocation5 + $0x598] sm:$0xff]   ;;  %v3434_v33 = vld [vmem:[#allocation5 + $0x550] sm:$0xff]  }
  0xb6   :  { %3073 = vmatpush3.bf16.msra.mxu0 %v3384_v34  ;;  %v3435_v34 = vld [vmem:[#allocation5 + $0x5d0] sm:$0xff]  }
  0xb7   :  { %3095 = vmatpush3.bf16.msra.mxu1 %v3385_v35  ;;  %3074 = vmatprep.subr.bf16.mxu0 %v3386_v36  ;;  %v3436_v35 = vld [vmem:[#allocation5 + $0x510] sm:$0xff]  }
  0xb8   :  { %3096 = vmatprep.subr.bf16.mxu1 %v3387_v38  ;;  %v3437_v36 = vld [vmem:[#allocation5 + $0x590] sm:$0xff]   ;;  %v3438_v38 = vld [vmem:[#allocation5 + $0x548] sm:$0xff]  }
  0xba   :  { %3075 = vmatpush3.bf16.msra.mxu0 %v3388_v39  ;;  %v3439_v39 = vld [vmem:[#allocation5 + $0x5c8] sm:$0xff]  }
  0xbb   :  { %3097 = vmatpush3.bf16.msra.mxu1 %v3389_v40  ;;  %3076 = vmatprep.subr.bf16.mxu0 %v3390_v41  ;;  %v3440_v40 = vld [vmem:[#allocation5 + $0x508] sm:$0xff]  }
  0xbc   :  { %3098 = vmatprep.subr.bf16.mxu1 %v3391_v42  ;;  %v3441_v41 = vld [vmem:[#allocation5 + $0x588] sm:$0xff]   ;;  %v3442_v42 = vld [vmem:[#allocation5 + $0x540] sm:$0xff]  }
  0xbe   :  { %3077 = vmatpush3.bf16.msra.mxu0 %v3392_v43  ;;  %v3443_v43 = vld [vmem:[#allocation5 + $0x5c0] sm:$0xff]  }
  0xbf   :  { %3099 = vmatpush3.bf16.msra.mxu1 %v3393_v44  ;;  %3078 = vmatprep.subr.bf16.mxu0 %v3394_v45  ;;  %v3446_v44 = vld [vmem:[#allocation2 + $0x14] ss:$24 sps:$4 sm:$0xff]   ;;  %v3447_v45 = vld [vmem:[#allocation2 + $0x44] ss:$24 sps:$4 sm:$0xff]  }
  0xc0   :  { %3100 = vmatprep.subr.bf16.mxu1 %v3395_v46  ;;  %v3448_v46 = vld [vmem:[#allocation2 + $0x74] ss:$24 sps:$4 sm:$0xff]  }
  0xc2   :  { %3079 = vmatpush3.bf16.msra.mxu0 %v3396_v47  ;;  %v3449_v47 = vld [vmem:[#allocation2 + $0xa4] ss:$24 sps:$4 sm:$0xff]  }
  0xc3   :  { %3101 = vmatpush3.bf16.msra.mxu1 %v3397_v48  ;;  %3080 = vmatprep.subr.bf16.mxu0 %v3398_v49  ;;  %v795_v48 = vrot.slane %v3446_v44, %v3588_v37  ;;  %v809_v49 = vrot.slane %v3447_v45, %v3588_v37  ;;  %v2698_v44 = vld [vmem:[%s3665_s2] ss:$0 sm:$0xff] }
  0xc4   :  { %3102 = vmatprep.subr.bf16.mxu1 %v3399_v50  ;;  %v823_v50 = vrot.slane %v3448_v46, %v3588_v37 }
  0xc6   :  { %3081 = vmatpush3.bf16.msra.mxu0 %v3400_v51  ;;  %v837_v51 = vrot.slane %v3449_v47, %v3588_v37 }
  0xc7   :  { %3103 = vmatpush3.bf16.msra.mxu1 %v3401_v52  ;;  %3082 = vmatprep.subr.bf16.mxu0 %v3402_v53  ;;  %v3444_v52 = vld [vmem:[#allocation5 + $0x500] sm:$0xff]  }
  0xc8   :  { %3104 = vmatprep.subr.bf16.mxu1 %v3403_v54  ;;  %v3445_v53 = vld [vmem:[#allocation5 + $0x580] sm:$0xff]   ;;  %v841_v54 = vcombine.high %v795_v48, %v809_v49  ;;  %v844_v57 = vcombine.low %v823_v50, %v837_v51 }
  0xca   :  { %3083 = vmatpush3.bf16.msra.mxu0 %v3404_v55  ;;  %v845_v55 = vcombine.high %v823_v50, %v837_v51  ;;  %v873_v58 = vrot.slane %v841_v54, %v3588_v37  ;;  %v887_v61 = vrot.slane %v844_v57, %v3588_v37 }
  0xcb   :  { %3105 = vmatpush3.bf16.msra.mxu1 %v3405_v56  ;;  %3112 = vmatprep.subr.bf16.mxu0 %v3414_v63  ;;  %v840_v56 = vcombine.low %v795_v48, %v809_v49 }
  0xcc   :  { %3134 = vmatprep.subr.bf16.mxu1 %v3415_v2  ;;  %v901_v59 = vrot.slane %v845_v55, %v3588_v37  ;;  %v2595_v2 = vld [vmem:[#allocation7 + $0x78] sm:$0xff] }
  0xcd   :  { %2447 = vmatmul.mubr.bf16.vlgmr.msra.gmra.mxu0 %v902_v15  ;;  %v859_v60 = vrot.slane %v840_v56, %v3588_v37  ;;  %v2590_v37 = vld [vmem:[#allocation7 + $0x50] sm:$0xff]  ;;  %v2581_v15 = vld [vmem:[#allocation7 + $0x8] sm:$0xff] }
  0xce   :  { %2488 = vmatmul.mubr.bf16.vlgmr.msra.gmra.mxu1 %v903_v16  ;;  %3113 = vmatpush3.bf16.msra.mxu0 %v3416_v11  ;;  %v908_v62 = vcombine.low %v873_v58, %v901_v59  ;;  %v909_v63 = vcombine.high %v873_v58, %v901_v59  ;;  %v2585_v11 = vld [vmem:[#allocation7 + $0x28] sm:$0xff]  ;;  %v2580_v16 = vld [vmem:[#allocation7] sm:$0xff] }
  0xcf   :  { %3135 = vmatpush3.bf16.msra.mxu1 %v3417_v12  ;;  %3114 = vmatprep.subr.bf16.mxu0 %v3418_v17  ;;  %v904_v0 = vcombine.low %v859_v60, %v887_v61  ;;  %v905_v1 = vcombine.high %v859_v60, %v887_v61  ;;  %v2584_v12 = vld [vmem:[#allocation7 + $0x20] sm:$0xff] }
  0xd0   :  { %3136 = vmatprep.subr.bf16.mxu1 %v3419_v18  ;;  %2528 = vmatprep.mubr.bf16.mxu0 %v908_v62 }
  0xd1   :  { %2569 = vmatprep.mubr.bf16.mxu1 %v909_v63 }
  0xd2   :  { %3115 = vmatpush3.bf16.msra.mxu0 %v3420_v19 }
  0xd3   :  { %3137 = vmatpush3.bf16.msra.mxu1 %v3421_v20  ;;  %3116 = vmatprep.subr.bf16.mxu0 %v3422_v21 }
  0xd4   :  { %3138 = vmatprep.subr.bf16.mxu1 %v3423_v22 }
  0xd6   :  { %3117 = vmatpush3.bf16.msra.mxu0 %v3424_v23 }
  0xd7   :  { %3139 = vmatpush3.bf16.msra.mxu1 %v3425_v24  ;;  %3118 = vmatprep.subr.bf16.mxu0 %v3426_v25 }
  0xd8   :  { %3140 = vmatprep.subr.bf16.mxu1 %v3427_v26 }
  0xda   :  { %3119 = vmatpush3.bf16.msra.mxu0 %v3428_v27 }
  0xdb   :  { %3141 = vmatpush3.bf16.msra.mxu1 %v3429_v28  ;;  %3120 = vmatprep.subr.bf16.mxu0 %v3430_v29 }
  0xdc   :  { %3142 = vmatprep.subr.bf16.mxu1 %v3431_v30 }
  0xde   :  { %3121 = vmatpush3.bf16.msra.mxu0 %v3432_v31 }
  0xdf   :  { %3143 = vmatpush3.bf16.msra.mxu1 %v3433_v32  ;;  %3122 = vmatprep.subr.bf16.mxu0 %v3434_v33 }
  0xe0   :  { %3144 = vmatprep.subr.bf16.mxu1 %v3435_v34 }
  0xe2   :  { %3123 = vmatpush3.bf16.msra.mxu0 %v3436_v35 }
  0xe3   :  { %3145 = vmatpush3.bf16.msra.mxu1 %v3437_v36  ;;  %3124 = vmatprep.subr.bf16.mxu0 %v3438_v38 }
  0xe4   :  { %3146 = vmatprep.subr.bf16.mxu1 %v3439_v39 }
  0xe6   :  { %3125 = vmatpush3.bf16.msra.mxu0 %v3440_v40 }
  0xe7   :  { %3147 = vmatpush3.bf16.msra.mxu1 %v3441_v41  ;;  %3126 = vmatprep.subr.bf16.mxu0 %v3442_v42 }
  0xe8   :  { %3148 = vmatprep.subr.bf16.mxu1 %v3443_v43 }
  0xea   :  { %3127 = vmatpush3.bf16.msra.mxu0 %v3444_v52 }
  0xeb   :  { %3149 = vmatpush3.bf16.msra.mxu1 %v3445_v53  ;;  %3174 = vmatprep.subr.mxu0 %v2595_v2 }
  0xed   :  { %2529 = vmatmul.mubr.bf16.vlgmr.msra.gmra.mxu0 %v904_v0 }
  0xee   :  { %2570 = vmatmul.mubr.bf16.vlgmr.msra.gmra.mxu1 %v905_v1  ;;  %3175 = vmatpush3.msra.mxu0 %v2595_v2 }
  0xef   :  { %3176 = vmatprep.subr.mxu0 %v2594_v3 }
  0xf0   :  { %3177 = vmatpush3.msra.mxu0 %v2594_v3 }
  0xf1   :  { %3178 = vmatprep.subr.mxu0 %v2593_v4 }
  0xf2   :  { %3179 = vmatpush3.msra.mxu0 %v2593_v4 }
  0xf3   :  { %3180 = vmatprep.subr.mxu0 %v2592_v5 }
  0xf4   :  { %3181 = vmatpush3.msra.mxu0 %v2592_v5 }
  0xf5   :  { %3182 = vmatprep.subr.mxu0 %v2591_v6 }
  0xf6   :  { %3183 = vmatpush3.msra.mxu0 %v2591_v6 }
  0xf7   :  { %3184 = vmatprep.subr.mxu0 %v2590_v37 }
  0xf8   :  { %3185 = vmatpush3.msra.mxu0 %v2590_v37 }
  0xf9   :  { %3186 = vmatprep.subr.mxu0 %v2589_v7 }
  0xfa   :  { %3187 = vmatpush3.msra.mxu0 %v2589_v7 }
  0xfb   :  { %3188 = vmatprep.subr.mxu0 %v2588_v8 }
  0xfc   :  { %3189 = vmatpush3.msra.mxu0 %v2588_v8 }
  0xfd   :  { %3190 = vmatprep.subr.mxu0 %v2587_v9 }
  0xfe   :  { %3191 = vmatpush3.msra.mxu0 %v2587_v9 }
  0xff   :  { %3192 = vmatprep.subr.mxu0 %v2586_v10 }
 0x100   :  { %3193 = vmatpush3.msra.mxu0 %v2586_v10 }
 0x101   :  { %3194 = vmatprep.subr.mxu0 %v2585_v11 }
 0x102   :  { %3195 = vmatpush3.msra.mxu0 %v2585_v11 }
 0x103   :  { %3196 = vmatprep.subr.mxu0 %v2584_v12 }
 0x104   :  { %3197 = vmatpush3.msra.mxu0 %v2584_v12 }
 0x105   :  { %3198 = vmatprep.subr.mxu0 %v2583_v13 }
 0x106   :  { %3199 = vmatpush3.msra.mxu0 %v2583_v13 }
 0x107   :  { %3200 = vmatprep.subr.mxu0 %v2582_v14 }
 0x108   :  { %3201 = vmatpush3.msra.mxu0 %v2582_v14 }
 0x109   :  { %3202 = vmatprep.subr.mxu0 %v2581_v15 }
 0x10a   :  { %3203 = vmatpush3.msra.mxu0 %v2581_v15 }
 0x10b   :  { %3204 = vmatprep.subr.mxu0 %v2580_v16 }
 0x10c   :  { %3205 = vmatpush3.msra.mxu0 %v2580_v16 }
 0x10d   :  { %v2908_v17 = vpop.f32.mrf.mxu0 }
 0x10e   :  { %v2930_v18 = vpop.f32.mrf.mxu1 }
 0x10f   :  { %v2909_v19 = vpop.f32.mrf.mxu0 }
 0x110   :  { %v2931_v20 = vpop.f32.mrf.mxu1  ;;  %v2910_v43 = vadd.f32 %v2909_v19, %v2908_v17 }
 0x111   :  { %v2911_v21 = vpop.f32.mrf.mxu0  ;;  %v2932_v48 = vadd.f32 %v2931_v20, %v2930_v18 }
 0x112   :  { %v2933_v22 = vpop.f32.mrf.mxu1  ;;  %v2121_v47 = vadd.f32 %v2910_v43, %v2698_v44 }
 0x113   :  { %v2912_v23 = vpop.f32.mrf.mxu0 }
 0x114   :  { %v2934_v24 = vpop.f32.mrf.mxu1  ;;  %v2913_v49 = vadd.f32 %v2912_v23, %v2911_v21  ;;  %v2162_v53 = vadd.f32 %v2932_v48, %v2121_v47 }
 0x115   :  { %v2935_v56 = vadd.f32 %v2934_v24, %v2933_v22 }
 0x116   :  { %v2124_v54 = vadd.f32 %v2913_v49, %v2698_v44 }
 0x118   :  { %v2165_v61 = vadd.f32 %v2935_v56, %v2124_v54 }
 0x12d   :  { %v2952_v25 = vpop.f32.mrf.mxu0 }
 0x12e   :  { %v2974_v26 = vpop.f32.mrf.mxu1 }
 0x12f   :  { %v2953_v27 = vpop.f32.mrf.mxu0 }
 0x130   :  { %v2975_v28 = vpop.f32.mrf.mxu1  ;;  %v2954_v51 = vadd.f32 %v2953_v27, %v2952_v25 }
 0x131   :  { %v2955_v29 = vpop.f32.mrf.mxu0  ;;  %v2976_v58 = vadd.f32 %v2975_v28, %v2974_v26 }
 0x132   :  { %v2977_v30 = vpop.f32.mrf.mxu1  ;;  %v2203_v57 = vadd.f32 %v2954_v51, %v2162_v53  ;;  %v2891_v53 = vld [vmem:[%s3667_s4] ss:$0 sm:$0xff] }
 0x133   :  { %v2956_v31 = vpop.f32.mrf.mxu0 }
 0x134   :  { %v2978_v32 = vpop.f32.mrf.mxu1  ;;  %v2957_v59 = vadd.f32 %v2956_v31, %v2955_v29  ;;  %v2244_v1 = vadd.f32 %v2976_v58, %v2203_v57 }
 0x135   :  { %v2979_v4 = vadd.f32 %v2978_v32, %v2977_v30 }
 0x136   :  { %v2206_v2 = vadd.f32 %v2957_v59, %v2165_v61 }
 0x138   :  { %v2247_v8 = vadd.f32 %v2979_v4, %v2206_v2 }
 0x14d   :  { %v2996_v33 = vpop.f32.mrf.mxu0 }
 0x14e   :  { %v3018_v34 = vpop.f32.mrf.mxu1 }
 0x14f   :  { %v2997_v35 = vpop.f32.mrf.mxu0 }
 0x150   :  { %v3019_v36 = vpop.f32.mrf.mxu1  ;;  %v2998_v62 = vadd.f32 %v2997_v35, %v2996_v33 }
 0x151   :  { %v2999_v38 = vpop.f32.mrf.mxu0  ;;  %v3020_v6 = vadd.f32 %v3019_v36, %v3018_v34 }
 0x152   :  { %v3021_v39 = vpop.f32.mrf.mxu1  ;;  %v2285_v5 = vadd.f32 %v2998_v62, %v2244_v1 }
 0x153   :  { %v3000_v40 = vpop.f32.mrf.mxu0 }
 0x154   :  { %v3022_v41 = vpop.f32.mrf.mxu1  ;;  %v3001_v37 = vadd.f32 %v3000_v40, %v2999_v38  ;;  %v2326_v11 = vadd.f32 %v3020_v6, %v2285_v5 }
 0x155   :  { %v3023_v14 = vadd.f32 %v3022_v41, %v3021_v39 }
 0x156   :  { %v2288_v12 = vadd.f32 %v3001_v37, %v2247_v8 }
 0x158   :  { %v2329_v19 = vadd.f32 %v3023_v14, %v2288_v12 }
 0x16d   :  { %v3040_v42 = vpop.f32.mrf.mxu0 }
 0x16e   :  { %v3062_v45 = vpop.f32.mrf.mxu1 }
 0x16f   :  { %v3041_v46 = vpop.f32.mrf.mxu0 }
 0x170   :  { %v3063_v50 = vpop.f32.mrf.mxu1  ;;  %v3042_v9 = vadd.f32 %v3041_v46, %v3040_v42 }
 0x171   :  { %v3043_v52 = vpop.f32.mrf.mxu0  ;;  %v3064_v16 = vadd.f32 %v3063_v50, %v3062_v45 }
 0x172   :  { %v3065_v55 = vpop.f32.mrf.mxu1  ;;  %v2367_v15 = vadd.f32 %v3042_v9, %v2326_v11 }
 0x173   :  { %v3044_v60 = vpop.f32.mrf.mxu0 }
 0x174   :  { %v3066_v63 = vpop.f32.mrf.mxu1  ;;  %v3045_v17 = vadd.f32 %v3044_v60, %v3043_v52  ;;  %v2408_v22 = vadd.f32 %v3064_v16, %v2367_v15 }
 0x175   :  { %v3067_v25 = vadd.f32 %v3066_v63, %v3065_v55 }
 0x176   :  { %v2370_v23 = vadd.f32 %v3045_v17, %v2329_v19 }
 0x178   :  { %v2411_v31 = vadd.f32 %v3067_v25, %v2370_v23 }
 0x18d   :  { %v3084_v0 = vpop.f32.mrf.mxu0 }
 0x18e   :  { %v3106_v3 = vpop.f32.mrf.mxu1 }
 0x18f   :  { %v3085_v7 = vpop.f32.mrf.mxu0 }
 0x190   :  { %v3107_v10 = vpop.f32.mrf.mxu1  ;;  %v3086_v20 = vadd.f32 %v3085_v7, %v3084_v0 }
 0x191   :  { %v3087_v13 = vpop.f32.mrf.mxu0  ;;  %v3108_v27 = vadd.f32 %v3107_v10, %v3106_v3 }
 0x192   :  { %v3109_v18 = vpop.f32.mrf.mxu1  ;;  %v2449_v26 = vadd.f32 %v3086_v20, %v2408_v22 }
 0x193   :  { %v3088_v21 = vpop.f32.mrf.mxu0 }
 0x194   :  { %v3110_v24 = vpop.f32.mrf.mxu1  ;;  %v3089_v28 = vadd.f32 %v3088_v21, %v3087_v13  ;;  %v2490_v34 = vadd.f32 %v3108_v27, %v2449_v26 }
 0x195   :  { %v3111_v40 = vadd.f32 %v3110_v24, %v3109_v18 }
 0x196   :  { %v2452_v35 = vadd.f32 %v3089_v28, %v2411_v31 }
 0x198   :  { %v2493_v45 = vadd.f32 %v3111_v40, %v2452_v35 }
 0x1ad   :  { %v3128_v29 = vpop.f32.mrf.mxu0 }
 0x1ae   :  { %v3150_v30 = vpop.f32.mrf.mxu1 }
 0x1af   :  { %v3129_v32 = vpop.f32.mrf.mxu0 }
 0x1b0   :  { %v3151_v33 = vpop.f32.mrf.mxu1  ;;  %v3130_v36 = vadd.f32 %v3129_v32, %v3128_v29 }
 0x1b1   :  { %v3131_v38 = vpop.f32.mrf.mxu0  ;;  %v3152_v42 = vadd.f32 %v3151_v33, %v3150_v30 }
 0x1b2   :  { %v3153_v39 = vpop.f32.mrf.mxu1  ;;  %v2531_v41 = vadd.f32 %v3130_v36, %v2490_v34 }
 0x1b3   :  { %v3132_v43 = vpop.f32.mrf.mxu0 }
 0x1b4   :  { %v3154_v44 = vpop.f32.mrf.mxu1  ;;  %v2572_v46 = vadd.f32 %v3152_v42, %v2531_v41  ;;  %v3133_v47 = vadd.f32 %v3132_v43, %v3131_v38 }
 0x1b5   :  { %v3155_v50 = vadd.f32 %v3154_v44, %v3153_v39 }
 0x1b6   :  { %v2578_v48 = vmax.f32 %v2572_v46, 0.0  ;;  %v2534_v49 = vadd.f32 %v3133_v47, %v2493_v45 }
 0x1b8   :  { %v2575_v51 = vadd.f32 %v3155_v50, %v2534_v49  ;;  %3206 = vmatprep.mubr.f32.mxu0 %v2578_v48 }
 0x1ba   :  { %v2579_v52 = vmax.f32 %v2575_v51, 0.0 }
 0x1bc   :  { %3207 = vmatmul.mubr.f32.vlgmr.msra.gmra.mxu0 %v2579_v52 }
 0x27c   :  { %v3208_v54 = vpop.f32.mrf.mxu0 }
 0x27d   :  { %v2675_v55 = vadd.f32 %v3208_v54, %v2891_v53 }
 0x27e   :  { %v2669_v56 = vpop.f32.mrf.mxu0 }
 0x27f   :  { %2679 = vst [vmem:[#allocation8 + $0x8] sm:$0xff] %v2675_v55  ;;  %v2670_v57 = vadd.f32 %v2891_v53, %v2669_v56 }
 0x281   :  { %2678 = vst [vmem:[#allocation8] sm:$0xff] %v2670_v57 }
 0x282   :  { %2684 = vsyncadd [#allocation4], 224  ;;  %s3546_s15 = smov [#allocation8]  }
 0x283   :  { %s2685_s16 = sshll.u32 %s3546_s15, 4  ;;  %s2686_s16 = int_to_ptr.vmem [resolvable:$true] %s2685_s16 }
 0x284   :  { %s3510_s17 = scalar_lea.vmem %s2686_s16, 32  ;;  %s3514_s18 = scalar_lea.vmem %s2686_s16, 256 }
 0x285   :  { %p3511_p1 = scmp.ne.s32.totalorder %s2686_s16, %s3510_s17  ;;  %p3515_p2 = scmp.lt.s32.totalorder %s2686_s16, %s2686_s16 }
 0x286   :  { %p3516_p3 = scmp.lt.s32.totalorder %s3514_s18, %s3510_s17 }
 0x288   :  { %p3517_p4 = por %p3516_p3, %p3515_p2 }
 0x28a   :  { %p3518_p5 = pnand %p3517_p4, %p3511_p1 }
 0x28c   :  { %3521 = shalt.err (!%p3518_p5)
}
 0x28d   :  { %s3547_s19 = smov 32   ;;  %s3548_s4 = smov 2  }
 0x28e   :  { %2691 = dma.vmem_to_hbm [thread:$0]  %s2686_s16, 32, %s3668_s5, [#allocation4], %s3547_s19, %s3547_s19, %s3548_s4  }
 0x28f   :  { %3534 = dma.done.wait [#allocation4], 256  }
 0x290   :  { %3535 = vsyncadd [#allocation4], 4294967040 }
 0x291   :  { %2695 = vsyncpa [#allocation3], 1 }
 0x292   :  { %2696 = vsyncpa [#allocation6], 1 }
 0x293   :  { %2697 = vsyncpa [#allocation4], 1 }

</bundles_post_ra>
